<compile_context>
chip_gen: v7x
topology: tpu7x:2x2x1
jax: 0.10.0
libtpu: 0.0.40
codegen_flags: <defaults>
</compile_context>

<pallas_src>
import functools

import jax
import jax.numpy as jnp
from jax import lax
from jax.experimental import pallas as pl
from jax.experimental.pallas import tpu as pltpu


def _lipool_kernel(sel_ref, x_ref, sum_ref, out_ref, nsum_ref, *, w: int):
    # sel_ref: (L, L/4) constant 0/1 lane-compaction matrix (same block every step)
    # x_ref/sum_ref/nsum_ref: (tm, L) blocks, L = P*2W; out_ref: (tm, L/4).
    l = x_ref.shape[-1]
    seg = 2 * w

    # Membrane accumulation in f32 (VPU).
    s = x_ref[...].astype(jnp.float32) + sum_ref[...].astype(jnp.float32)

    # Per-lane position within its 2W segment (cheap: one (1, L) iota per step).
    lane = lax.broadcasted_iota(jnp.int32, (1, l), 1)
    j = lane % seg
    top = j < w            # lanes holding image row 2m of the window pair
    even = (j % 2) == 0    # even image column

    # Vertical (H) window max: partner lane is i+W inside the segment.
    # roll(x, l-w)[i] == x[i+w]  (jnp.roll semantics, positive shift only).
    hmax = jnp.maximum(s, pltpu.roll(s, l - w, axis=1))            # valid at top lanes
    # Horizontal (W) pair max: partner lane is i+1.
    pm = jnp.maximum(hmax, pltpu.roll(hmax, l - 1, axis=1))        # pooled at top & even lanes

    # Nearest-neighbour 2x upsample (lateral inhibition), exact via roll+select:
    #   bottom-row lanes take the value from lane i-W, odd lanes from lane i-1.
    pm_row = jnp.where(top, pm, pltpu.roll(pm, w, axis=1))
    up = jnp.where(even, pm_row, pltpu.roll(pm_row, 1, axis=1))

    nsum_ref[...] = (s - up).astype(nsum_ref.dtype)                # bit-exact inhibition

    # Dense lane compaction of the pooled maxima: one exact 0/1 selection matmul.
    out_ref[...] = jnp.dot(
        pm, sel_ref[...],
        precision=lax.Precision.HIGHEST,
        preferred_element_type=jnp.float32,
    ).astype(out_ref.dtype)


def _pick_pack(m0: int, w: int, max_lanes: int = 512) -> int:
    """Largest divisor P of m0 with P*2W <= max_lanes (lane-dense packing)."""
    seg = 2 * w
    p_max = max(1, max_lanes // seg)
    best = 1
    for p in range(1, min(m0, p_max) + 1):
        if m0 % p == 0:
            best = p
    return best


def lipool_forward(x: jax.Array, sumspike: jax.Array, *, block_rows: int | None = None):
    """Pallas LIPool forward: returns (out, new_sumspike).  State is kept in f32."""
    if x.shape != sumspike.shape:
        raise ValueError(f"x {x.shape} and sumspike {sumspike.shape} must match")
    n, c, h, w = x.shape
    if h % 2 or w % 2:
        raise ValueError("LIPool kernel requires even H and W (MaxPool2d(2, 2)).")

    out_dtype = jnp.result_type(x.dtype, sumspike.dtype)
    m0 = n * c * (h // 2)                  # number of vertical window pairs
    p = _pick_pack(m0, w)                  # window pairs packed per kernel row
    seg = 2 * w
    l = p * seg                            # kernel lane width
    lo = p * (w // 2)                      # output lane width
    m = m0 // p                            # kernel rows

    x2 = x.reshape(m, l)
    s2 = sumspike.astype(jnp.float32).reshape(m, l)   # membrane state always f32

    # Constant 0/1 lane-compaction matrix: column o picks lane
    # (o // (W/2)) * 2W + 2 * (o % (W/2))  (top & even lane of its window).
    kk = jnp.arange(l)[:, None]
    oo = jnp.arange(lo)[None, :]
    sel = ((kk // seg == oo // (w // 2)) &
           (kk % seg == 2 * (oo % (w // 2)))).astype(jnp.float32)

    # Sublane alignment matched to the packed-sublane size of the dtypes used.
    sublane = max(8,
                  32 // jnp.dtype(x.dtype).itemsize,
                  32 // jnp.dtype(out_dtype).itemsize)

    if block_rows is not None:
        tm = int(block_rows)
    else:
        # ~16 MiB budget: 2x double-buffered I/O blocks + ~4 f32 temporaries.
        isz = jnp.dtype(out_dtype).itemsize
        xsz = jnp.dtype(x.dtype).itemsize
        blk_per_row = l * xsz + 4 * l + 4 * l + lo * isz     # x + sumspike + nsum + out
        per_row = 2 * blk_per_row + 4 * 4 * l                # double buffers + temps
        tm = max(sublane, (16 * 1024 * 1024) // per_row)
        # Keep >= ~8 grid steps when possible (pipelining + dual-TC sharding on v7x).
        tm = min(tm, max(sublane, pl.cdiv(m, 8)))

    tm = min(tm, m)
    if tm < m:
        tm = max(sublane, (tm // sublane) * sublane)
        tm = min(tm, m)
    grid = (pl.cdiv(m, tm),)

    out2, nsum2 = pl.pallas_call(
        functools.partial(_lipool_kernel, w=w),
        out_shape=(
            jax.ShapeDtypeStruct((m, lo), out_dtype),
            jax.ShapeDtypeStruct((m, l), jnp.float32),
        ),
        grid=grid,
        in_specs=[
            pl.BlockSpec((l, lo), lambda i: (0, 0)),   # sel: fetched once (constant block)
            pl.BlockSpec((tm, l), lambda i: (i, 0)),   # x
            pl.BlockSpec((tm, l), lambda i: (i, 0)),   # sumspike
        ],
        out_specs=(
            pl.BlockSpec((tm, lo), lambda i: (i, 0)),  # pooled output
            pl.BlockSpec((tm, l), lambda i: (i, 0)),   # new sumspike
        ),
        input_output_aliases={2: 1},                   # sumspike buffer -> new_sumspike
        compiler_params=pltpu.CompilerParams(
            dimension_semantics=("parallel",),
            vmem_limit_bytes=32 * 1024 * 1024,
        ),
    )(sel, x2, s2)

    out = out2.reshape(n, c, h // 2, w // 2)
    new_sumspike = nsum2.reshape(n, c, h, w)
    return out, new_sumspike


def lipool_ref(x: jax.Array, sumspike: jax.Array):
    """Pure-JAX reference for LIPool.forward with MaxPool2d(2, 2) child."""
    s = sumspike.astype(jnp.float32) + x.astype(jnp.float32)
    n, c, h, w = s.shape
    pooled = s.reshape(n, c, h // 2, 2, w // 2, 2).max(axis=(3, 5))
    up = jnp.repeat(jnp.repeat(pooled, 2, axis=2), 2, axis=3)
    return pooled, s - up


if __name__ == "__main__":
    n, c, h, w = 2, 4, 16, 16
    key = jax.random.PRNGKey(0)
    k1, k2 = jax.random.split(key)
    x1 = jax.random.uniform(k1, (n, c, h, w), dtype=jnp.float32)
    x2 = jax.random.uniform(k2, (n, c, h, w), dtype=jnp.float32)
    sumspike0 = jnp.zeros((n, c, h, w), jnp.float32)

    # Two "timesteps" to exercise the stateful accumulation + lateral inhibition.
    out1, ss1 = lipool_forward(x1, sumspike0)
    out2, ss2 = lipool_forward(x2, ss1)
    out1, ss1, out2, ss2 = jax.block_until_ready((out1, ss1, out2, ss2))

    r_out1, r_ss1 = lipool_ref(x1, sumspike0)
    r_out2, r_ss2 = lipool_ref(x2, r_ss1)

    assert out1.shape == (n, c, h // 2, w // 2), out1.shape
    assert ss2.shape == (n, c, h, w), ss2.shape
    for got, ref in ((out1, r_out1), (ss1, r_ss1), (out2, r_out2), (ss2, r_ss2)):
        assert jnp.allclose(got, ref, atol=1e-5, rtol=1e-5), "mismatch vs reference"

    # Larger case forcing a multi-tile (grid > 1) pipelined path.
    n2, c2, h2, w2 = 2, 8, 32, 32
    xb = jax.random.uniform(k1, (n2, c2, h2, w2), dtype=jnp.float32)
    ssb = jax.random.normal(k2, (n2, c2, h2, w2), dtype=jnp.float32) * 0.1
    outb, nssb = lipool_forward(xb, ssb, block_rows=8)
    outb, nssb = jax.block_until_ready((outb, nssb))
    r_outb, r_nssb = lipool_ref(xb, ssb)
    assert jnp.allclose(outb, r_outb, atol=1e-5, rtol=1e-5), "tiled out mismatch"
    assert jnp.allclose(nssb, r_nssb, atol=1e-5, rtol=1e-5), "tiled sumspike mismatch"

    print("KERNEL_OK")
</pallas_src>

<mosaic_0001>
module attributes {stable_mosaic.version = 11 : i64} {
  func.func @_lipool_kernel(%arg0: i32, %arg1: memref<512x128xf32, #tpu.memory_space<vmem>>, %arg2: memref<4x512xf32, #tpu.memory_space<vmem>>, %arg3: memref<4x512xf32, #tpu.memory_space<vmem>>, %arg4: memref<4x128xf32, #tpu.memory_space<vmem>>, %arg5: memref<4x512xf32, #tpu.memory_space<vmem>>) attributes {dimension_semantics = [#tpu.dimension_semantics<parallel>], iteration_bounds = array<i64: 1>, scalar_prefetch = 0 : i64, scratch_operands = 0 : i64, tpu.core_type = #tpu.core_type<tc>, window_params = [{pipeline_mode = #tpu.pipeline_mode<synchronous>, transform_indices = @transform_0, window_bounds = array<i64: 512, 128>}, {transform_indices = @transform_1, window_bounds = array<i64: 4, 512>}, {transform_indices = @transform_2, window_bounds = array<i64: 4, 512>}, {transform_indices = @transform_3, window_bounds = array<i64: 4, 128>}, {transform_indices = @transform_4, window_bounds = array<i64: 4, 512>}]} {
    %c0 = arith.constant 0 : index
    %c0_0 = arith.constant 0 : index
    %0 = vector.load %arg2[%c0, %c0_0] : memref<4x512xf32, #tpu.memory_space<vmem>>, vector<4x512xf32>
    %c0_1 = arith.constant 0 : index
    %c0_2 = arith.constant 0 : index
    %1 = vector.load %arg3[%c0_1, %c0_2] : memref<4x512xf32, #tpu.memory_space<vmem>>, vector<4x512xf32>
    %2 = arith.addf %0, %1 : vector<4x512xf32>
    %3 = tpu.iota {dimensions = array<i32: 1>} : vector<1x512xi32>
    %c32_i32 = arith.constant 32 : i32
    %c0_i32 = arith.constant 0 : i32
    %4 = arith.cmpi eq, %c32_i32, %c0_i32 : i32
    %c1_i32 = arith.constant 1 : i32
    %5 = arith.select %4, %c1_i32, %c32_i32 : i32
    %6 = vector.broadcast %5 : i32 to vector<1x512xi32>
    %7 = arith.remsi %3, %6 : vector<1x512xi32>
    %c0_i32_3 = arith.constant 0 : i32
    %8 = vector.broadcast %c0_i32_3 : i32 to vector<1x512xi32>
    %9 = arith.cmpi ne, %7, %8 : vector<1x512xi32>
    %c0_i32_4 = arith.constant 0 : i32
    %10 = vector.broadcast %c0_i32_4 : i32 to vector<1x512xi32>
    %11 = arith.cmpi slt, %7, %10 : vector<1x512xi32>
    %c0_i32_5 = arith.constant 0 : i32
    %12 = arith.cmpi slt, %5, %c0_i32_5 : i32
    %13 = vector.broadcast %12 : i1 to vector<1x512xi1>
    %14 = vector.broadcast %13 : vector<1x512xi1> to vector<1x512xi1>
    %15 = arith.xori %11, %14 : vector<1x512xi1>
    %16 = arith.andi %15, %9 : vector<1x512xi1>
    %17 = vector.broadcast %5 : i32 to vector<1x512xi32>
    %18 = arith.addi %7, %17 : vector<1x512xi32>
    %19 = arith.select %16, %18, %7 : vector<1x512xi1>, vector<1x512xi32>
    %c16_i32 = arith.constant 16 : i32
    %20 = vector.broadcast %c16_i32 : i32 to vector<1x512xi32>
    %21 = arith.cmpi slt, %19, %20 : vector<1x512xi32>
    %c2_i32 = arith.constant 2 : i32
    %c0_i32_6 = arith.constant 0 : i32
    %22 = arith.cmpi eq, %c2_i32, %c0_i32_6 : i32
    %c1_i32_7 = arith.constant 1 : i32
    %23 = arith.select %22, %c1_i32_7, %c2_i32 : i32
    %24 = vector.broadcast %23 : i32 to vector<1x512xi32>
    %25 = arith.remsi %19, %24 : vector<1x512xi32>
    %c0_i32_8 = arith.constant 0 : i32
    %26 = vector.broadcast %c0_i32_8 : i32 to vector<1x512xi32>
    %27 = arith.cmpi ne, %25, %26 : vector<1x512xi32>
    %c0_i32_9 = arith.constant 0 : i32
    %28 = vector.broadcast %c0_i32_9 : i32 to vector<1x512xi32>
    %29 = arith.cmpi slt, %25, %28 : vector<1x512xi32>
    %c0_i32_10 = arith.constant 0 : i32
    %30 = arith.cmpi slt, %23, %c0_i32_10 : i32
    %31 = vector.broadcast %30 : i1 to vector<1x512xi1>
    %32 = vector.broadcast %31 : vector<1x512xi1> to vector<1x512xi1>
    %33 = arith.xori %29, %32 : vector<1x512xi1>
    %34 = arith.andi %33, %27 : vector<1x512xi1>
    %35 = vector.broadcast %23 : i32 to vector<1x512xi32>
    %36 = arith.addi %25, %35 : vector<1x512xi32>
    %37 = arith.select %34, %36, %25 : vector<1x512xi1>, vector<1x512xi32>
    %c0_i32_11 = arith.constant 0 : i32
    %38 = vector.broadcast %c0_i32_11 : i32 to vector<1x512xi32>
    %39 = arith.cmpi eq, %37, %38 : vector<1x512xi32>
    %c496_i32 = arith.constant 496 : i32
    %40 = tpu.dynamic_rotate %2 by %c496_i32 dim 1 : vector<4x512xf32>, i32 -> vector<4x512xf32>
    %41 = arith.maximumf %2, %40 : vector<4x512xf32>
    %c511_i32 = arith.constant 511 : i32
    %42 = tpu.dynamic_rotate %41 by %c511_i32 dim 1 : vector<4x512xf32>, i32 -> vector<4x512xf32>
    %43 = arith.maximumf %41, %42 : vector<4x512xf32>
    %c16_i32_12 = arith.constant 16 : i32
    %44 = tpu.dynamic_rotate %43 by %c16_i32_12 dim 1 : vector<4x512xf32>, i32 -> vector<4x512xf32>
    %45 = vector.shape_cast %21 : vector<1x512xi1> to vector<1x512xi1>
    %46 = vector.broadcast %45 : vector<1x512xi1> to vector<4x512xi1>
    %47 = arith.select %46, %43, %44 : vector<4x512xi1>, vector<4x512xf32>
    %c1_i32_13 = arith.constant 1 : i32
    %48 = tpu.dynamic_rotate %47 by %c1_i32_13 dim 1 : vector<4x512xf32>, i32 -> vector<4x512xf32>
    %49 = vector.shape_cast %39 : vector<1x512xi1> to vector<1x512xi1>
    %50 = vector.broadcast %49 : vector<1x512xi1> to vector<4x512xi1>
    %51 = arith.select %50, %47, %48 : vector<4x512xi1>, vector<4x512xf32>
    %52 = arith.subf %2, %51 : vector<4x512xf32>
    %c0_14 = arith.constant 0 : index
    %c0_15 = arith.constant 0 : index
    %53 = vector.load %arg5[%c0_14, %c0_15] : memref<4x512xf32, #tpu.memory_space<vmem>>, vector<4x512xf32>
    tpu.vector_store %arg5[%c0_14, %c0_15], %52 {strides = array<i32>} : memref<4x512xf32, #tpu.memory_space<vmem>>, vector<4x512xf32>,
    %c0_16 = arith.constant 0 : index
    %c0_17 = arith.constant 0 : index
    %54 = vector.load %arg1[%c0_16, %c0_17] : memref<512x128xf32, #tpu.memory_space<vmem>>, vector<512x128xf32>
    %cst = arith.constant dense<0.000000e+00> : vector<4x128xf32>
    %55 = tpu.matmul %43, %54, %cst {dimension_numbers = #tpu.dot_dimension_numbers<[1], [0], [0], [1], [0, 0, 1, 1], [], []>, precision = #tpu.contract_precision<fp32>} : vector<4x512xf32>, vector<512x128xf32>, vector<4x128xf32> -> vector<4x128xf32>
    %c0_18 = arith.constant 0 : index
    %c0_19 = arith.constant 0 : index
    %56 = vector.load %arg4[%c0_18, %c0_19] : memref<4x128xf32, #tpu.memory_space<vmem>>, vector<4x128xf32>
    tpu.vector_store %arg4[%c0_18, %c0_19], %55 {strides = array<i32>} : memref<4x128xf32, #tpu.memory_space<vmem>>, vector<4x128xf32>,
    return
  }
  func.func @transform_0(%arg0: i32) -> (i32, i32) {
    %c0_i32 = arith.constant 0 : i32
    %c0_i32_0 = arith.constant 0 : i32
    %c0_i32_1 = arith.constant 0 : i32
    return %c0_i32, %c0_i32_0 : i32, i32
  }
  func.func @transform_1(%arg0: i32) -> (i32, i32) {
    %c0_i32 = arith.constant 0 : i32
    %c0_i32_0 = arith.constant 0 : i32
    return %arg0, %c0_i32 : i32, i32
  }
  func.func @transform_2(%arg0: i32) -> (i32, i32) {
    %c0_i32 = arith.constant 0 : i32
    %c0_i32_0 = arith.constant 0 : i32
    return %arg0, %c0_i32 : i32, i32
  }
  func.func @transform_3(%arg0: i32) -> (i32, i32) {
    %c0_i32 = arith.constant 0 : i32
    %c0_i32_0 = arith.constant 0 : i32
    return %arg0, %c0_i32 : i32, i32
  }
  func.func @transform_4(%arg0: i32) -> (i32, i32) {
    %c0_i32 = arith.constant 0 : i32
    %c0_i32_0 = arith.constant 0 : i32
    return %arg0, %c0_i32 : i32, i32
  }
}

</mosaic_0001>

<bundles_post_ra>
// kernel: tpu_custom_call.1
= control target key start
LH: loop header
LB: loop body
LE: loop exit
PB: predicated region body
PF: predicated region fallthrough
CT: control target
= control target key end

     0   :  { %10 = vsyncpa [#allocation3], 0  ;;  %s4504_s0 = inlined_call_operand.hbm [shape: f32[512,128], index: 0, kind: input, shape index: {}]   ;;  %s4505_s1 = inlined_call_operand.vmem [shape: f32[4,512], index: 1, kind: input, shape index: {}]   ;;  %s4506_s2 = inlined_call_operand.hbm [shape: f32[4,512], index: 2, kind: input, shape index: {}, may-alias: {2,4}]   ;;  %s4507_s3 = inlined_call_operand.hbm [shape: f32[4,128], index: 3, kind: output, shape index: {0}]   ;;  %s4508_s4 = inlined_call_operand.hbm [shape: f32[4,512], index: 4, kind: output, shape index: {1}, may-alias: {2,4}]  }
   0x1   :  { %11 = vsyncpa [#allocation6], 0 }
   0x2   :  { %12 = vsyncpa [#allocation4], 0 }
   0x3   :  { %13 = vsyncpa [#allocation9], 0  ;;  %s3014_s15 = smov [#allocation2]   ;;  %s2918_s19 = scalar_lea.hbm %s4504_s0, 8192 }
   0x4   :  { %s19_s16 = sshll.u32 %s3014_s15, 4  ;;  %p2919_p0 = scmp.ne.s32.totalorder %s4504_s0, %s2918_s19  ;;  %s20_s16 = int_to_ptr.vmem [resolvable:$true] %s19_s16 }
   0x5   :  { %p2922_p1 = scmp.lt.u32.totalorder %s2918_s19, %s4504_s0 }
   0x7   :  { %p2924_p2 = pnand %p2922_p1, %p2919_p0 }
   0x9   :  { %2927 = shalt.err (!%p2924_p2)
}
   0xa   :  { %s2928_s24 = scalar_lea.vmem %s20_s16, 8192  ;;  %p2933_p4 = scmp.lt.s32.totalorder %s20_s16, %s20_s16 }
   0xb   :  { %p2929_p3 = scmp.ne.s32.totalorder %s20_s16, %s2928_s24  ;;  %p2934_p5 = scmp.lt.s32.totalorder %s2928_s24, %s2928_s24 }
   0xd   :  { %p2935_p6 = por %p2934_p5, %p2933_p4 }
   0xf   :  { %p2936_p7 = pnand %p2935_p6, %p2929_p3 }
  0x11   :  { %2939 = shalt.err (!%p2936_p7)
}
  0x12   :  { %s3015_s25 = smov 128   ;;  %s3016_s26 = smov 8  }
  0x13   :  { %25 = dma.hbm_to_vmem [thread:$0]  %s4504_s0, 8192, %s20_s16, [#allocation3], %s3015_s25, %s3015_s25, %s3016_s26  }
  0x14   :  { %s3017_s29 = smov [#allocation5]   ;;  %s2940_s7 = scalar_lea.hbm %s4506_s2, 256 }
  0x15   :  { %s34_s30 = sshll.u32 %s3017_s29, 4  ;;  %p2941_p8 = scmp.ne.s32.totalorder %s4506_s2, %s2940_s7  ;;  %s35_s30 = int_to_ptr.vmem [resolvable:$true] %s34_s30 }
  0x16   :  { %p2944_p9 = scmp.lt.u32.totalorder %s2940_s7, %s4506_s2 }
  0x18   :  { %p2946_p10 = pnand %p2944_p9, %p2941_p8 }
  0x1a   :  { %2949 = shalt.err (!%p2946_p10)
}
  0x1b   :  { %s2950_s12 = scalar_lea.vmem %s35_s30, 256  ;;  %p2955_p12 = scmp.lt.s32.totalorder %s35_s30, %s35_s30 }
  0x1c   :  { %p2951_p11 = scmp.ne.s32.totalorder %s35_s30, %s2950_s12  ;;  %p2956_p13 = scmp.lt.s32.totalorder %s2950_s12, %s2950_s12 }
  0x1e   :  { %p2957_p0 = por %p2956_p13, %p2955_p12 }
  0x20   :  { %p2958_p1 = pnand %p2957_p0, %p2951_p11 }
  0x22   :  { %2961 = shalt.err (!%p2958_p1)
}
  0x23   :  { %37 = dma.hbm_to_vmem [thread:$0]  %s4506_s2, 256, %s35_s30, [#allocation6]  }
  0x24   :  { %3006 = dma.done.wait [#allocation3], 8192  }
  0x25   :  { %3007 = vsyncadd [#allocation3], 4294959104 }
  0x26   :  { %3008 = dma.done.wait [#allocation6], 256  }
  0x27   :  { %3009 = vsyncadd [#allocation6], 4294967040  ;;  %v45_v0 = vld [vmem:[%s4505_s1 + $0x8] sm:$0xff]  ;;  %v47_v1 = vld [vmem:[#allocation5 + $0x8] sm:$0xff]  ;;  %s3018_s18 = smov 112   ;;  %s3020_s2 = smov 16  }
  0x28   :  { %v44_v2 = vld [vmem:[%s4505_s1] sm:$0xff]  ;;  %v3079_v3 = vadd.f32 %v47_v1, %v45_v0  ;;  %v46_v4 = vld [vmem:[#allocation5] sm:$0xff]  ;;  %v302_v9 = vld [vmem:[#allocation2 + $0x88] sm:$0xff]  ;;  %s3019_s1 = smov 127   ;;  %s3021_s19 = smov 1  }
  0x29   :  { %v3081_v5 = vadd.f32 %v46_v4, %v44_v2  ;;  %v301_v8 = vld [vmem:[#allocation2 + $0x80] sm:$0xff]  ;;  %v401_v12 = vand.u32 4294901760, %v302_v9  ;;  %v286_v13 = vld [vmem:[#allocation2 + $0x8] sm:$0xff]  ;;  %v3092_v15 = vld [vmem:[#allocation2 + $0x90] sm:$0xff]  ;;  %s3022_s20 = smov [#allocation8]  }
  0x2a   :  { %4665 = vst [vmem:[#allocation14_spill] sm:$0xff] %v3079_v3  ;;  %169 = vrot.lane.b32.xlu1 %v3079_v3, %s3018_s18  ;;  %v162_v6 = vcombine.high %v3079_v3, %v3079_v3  ;;  %v3089_v10 = vld [vmem:[#allocation2] sm:$0xff]  ;;  %v398_v11 = vand.u32 4294901760, %v301_v8  ;;  %v3094_v16 = vld [vmem:[#allocation2 + $0x98] sm:$0xff]  ;;  %v353_v17 = vand.u32 4294901760, %v286_v13  ;;  %v404_v18 = vand.u32 4294901760, %v3092_v15 }
  0x2b   :  { %4666 = vst [vmem:[#allocation15_spill] sm:$0xff] %v3081_v5  ;;  %165 = vrot.lane.b32.xlu0 %v3081_v5, %s3018_s18  ;;  %v161_v7 = vcombine.high %v3081_v5, %v3081_v5  ;;  %v350_v14 = vand.u32 4294901760, %v3089_v10  ;;  %v407_v19 = vand.u32 4294901760, %v3094_v16  ;;  %v3098_v20 = vld [vmem:[#allocation2 + $0x10] sm:$0xff]  ;;  %v3100_v21 = vld [vmem:[#allocation2 + $0x18] sm:$0xff]  ;;  %v3104_v23 = vsub.f32 %v302_v9, %v401_v12  ;;  %v3153_v46 = vld [vmem:[#allocation2 + $0xa0] sm:$0xff] }
  0x2c   :  { %v3102_v22 = vsub.f32 %v301_v8, %v398_v11  ;;  %v356_v25 = vand.u32 4294901760, %v3098_v20  ;;  %v3110_v26 = vsub.f32 %v286_v13, %v353_v17  ;;  %v3113_v27 = vsub.f32 %v3092_v15, %v404_v18  ;;  %v3158_v51 = vld [vmem:[#allocation2 + $0xa8] sm:$0xff]  ;;  %v3163_v56 = vld [vmem:[#allocation2 + $0x20] sm:$0xff]  ;;  %v3170_v62 = vld [vmem:[#allocation2 + $0xb0] sm:$0xff]  ;;  %s2090_s21 = sshll.u32 %s3022_s20, 4  ;;  %s2091_s21 = int_to_ptr.vmem [resolvable:$true] %s2090_s21 }
  0x2d   :  { %v3107_v24 = vsub.f32 %v3089_v10, %v350_v14  ;;  %v3116_v28 = vsub.f32 %v3094_v16, %v407_v19  ;;  %v359_v29 = vand.u32 4294901760, %v3100_v21  ;;  %v4527_v31 = vand.u32 4294901760, %v3104_v23  ;;  %v3165_v57 = vld [vmem:[#allocation2 + $0x28] sm:$0xff]  ;;  %v3173_v4 = vld [vmem:[#allocation2 + $0xb8] sm:$0xff]  ;;  %v3183_v10 = vld [vmem:[#allocation2 + $0x30] sm:$0xff]  ;;  %s2962_s22 = scalar_lea.vmem %s2091_s21, 256  ;;  %p2967_p3 = scmp.lt.s32.totalorder %s2091_s21, %s2091_s21 }
  0x2e   :  { %171 = vrot.lane.b32.xlu1 %v162_v6, %s3018_s18  ;;  %v4528_v30 = vand.u32 4294901760, %v3102_v22  ;;  %v3125_v33 = vsub.f32 %v3098_v20, %v356_v25  ;;  %v4525_v34 = vand.u32 4294901760, %v3110_v26  ;;  %v4522_v35 = vand.u32 4294901760, %v3113_v27  ;;  %p2963_p2 = scmp.ne.s32.totalorder %s2091_s21, %s2962_s22  ;;  %p2968_p4 = scmp.lt.s32.totalorder %s2962_s22, %s2962_s22 }
  0x2f   :  { %167 = vrot.lane.b32.xlu0 %v161_v7, %s3018_s18  ;;  %v4526_v32 = vand.u32 4294901760, %v3107_v24  ;;  %v4521_v36 = vand.u32 4294901760, %v3116_v28  ;;  %v3131_v37 = vsub.f32 %v3100_v21, %v359_v29  ;;  %v584_v39 = vsub.f32 %v3104_v23, %v4527_v31 }
  0x30   :  { %v577_v38 = vsub.f32 %v3102_v22, %v4528_v30  ;;  %v4519_v41 = vand.u32 4294901760, %v3125_v33  ;;  %v472_v42 = vsub.f32 %v3110_v26, %v4525_v34  ;;  %v591_v43 = vsub.f32 %v3113_v27, %v4522_v35  ;;  %v3357_v30 = vld [vmem:[#allocation2 + $0x60] sm:$0xff]  ;;  %p2969_p5 = por %p2968_p4, %p2967_p3 }
  0x31   :  { %v465_v40 = vsub.f32 %v3107_v24, %v4526_v32  ;;  %v598_v44 = vsub.f32 %v3116_v28, %v4521_v36  ;;  %v4517_v45 = vand.u32 4294901760, %v3131_v37  ;;  %v585_v48 = vand.u32 4294901760, %v584_v39  ;;  %v3315_v36 = vld [vmem:[#allocation2 + $0xd0] sm:$0xff] }
  0x32   :  { %v578_v47 = vand.u32 4294901760, %v577_v38  ;;  %v479_v50 = vsub.f32 %v3125_v33, %v4519_v41  ;;  %v473_v52 = vand.u32 4294901760, %v472_v42  ;;  %v592_v53 = vand.u32 4294901760, %v591_v43  ;;  %v3200_v38 = vld [vmem:[#allocation2 + $0x38] sm:$0xff]  ;;  %p2970_p6 = pnand %p2969_p5, %p2963_p2 }
  0x33   :  { %v466_v49 = vand.u32 4294901760, %v465_v40  ;;  %v599_v54 = vand.u32 4294901760, %v598_v44  ;;  %v486_v55 = vsub.f32 %v3131_v37, %v4517_v45  ;;  %v3167_v60 = vpack.c.bf16 %v401_v12, %v398_v11 }
  0x34   :  { %v2556_v58 = vpack.c.bf16 %v585_v48, %v578_v47  ;;  %v480_v59 = vand.u32 4294901760, %v479_v50  ;;  %v410_v61 = vand.u32 4294901760, %v3153_v46  ;;  %v413_v2 = vand.u32 4294901760, %v3158_v51 }
  0x35   :  { %v2558_v63 = vpack.c.bf16 %v473_v52, %v466_v49  ;;  %v2560_v0 = vpack.c.bf16 %v599_v54, %v592_v53  ;;  %v487_v1 = vand.u32 4294901760, %v486_v55  ;;  %2525 = vmatprep.subr.bf16.mxu0 %v3167_v60  ;;  %v3179_v7 = vpack.c.bf16 %v353_v17, %v350_v14 }
  0x36   :  { %2557 = vmatprep.subr.bf16.mxu1 %v2556_v58  ;;  %v3177_v6 = vsub.f32 %v3153_v46, %v410_v61  ;;  %v362_v8 = vand.u32 4294901760, %v3163_v56  ;;  %v365_v9 = vand.u32 4294901760, %v3165_v57  ;;  %v3186_v12 = vsub.f32 %v3158_v51, %v413_v2 }
  0x37   :  { %2559 = vmatpush3.bf16.msra.mxu1 %v2558_v63  ;;  %v2562_v11 = vpack.c.bf16 %v487_v1, %v480_v59  ;;  %v3188_v13 = vpack.c.bf16 %v407_v19, %v404_v18  ;;  %v4544_v15 = vand.u32 4294901760, %v3170_v62  ;;  %2527 = vmatpush3.bf16.msra.mxu0 %v3179_v7  ;;  %v4543_v21 = vand.u32 4294901760, %v3173_v4  ;;  %v3260_v1 = vld [vmem:[#allocation2 + $0x40] sm:$0xff] }
  0x38   :  { %2561 = vmatprep.subr.bf16.mxu1 %v2560_v0  ;;  %v4516_v16 = vand.u32 4294901760, %v3177_v6  ;;  %v3194_v14 = vsub.f32 %v3163_v56, %v362_v8  ;;  %v3197_v17 = vsub.f32 %v3165_v57, %v365_v9  ;;  %v4515_v18 = vand.u32 4294901760, %v3186_v12  ;;  %v3251_v56 = vld [vmem:[#allocation2 + $0xc0] sm:$0xff]  ;;  %v3253_v57 = vld [vmem:[#allocation2 + $0xc8] sm:$0xff] }
  0x39   :  { %2529 = vmatprep.subr.bf16.mxu0 %v3188_v13  ;;  %v3207_v19 = vsub.f32 %v3170_v62, %v4544_v15  ;;  %v3211_v39 = vpack.c.bf16 %v359_v29, %v356_v25  ;;  %v4538_v40 = vand.u32 4294901760, %v3183_v10  ;;  %v3222_v46 = vsub.f32 %v3173_v4, %v4543_v21 }
  0x3a   :  { %4667 = vst [vmem:[#allocation16_spill] sm:$0xff] %v3194_v14  ;;  %4668 = vst [vmem:[#allocation17_spill] sm:$0xff] %v3197_v17  ;;  %v605_v42 = vsub.f32 %v3177_v6, %v4516_v16  ;;  %v4514_v43 = vand.u32 4294901760, %v3194_v14  ;;  %v4510_v44 = vand.u32 4294901760, %v3197_v17  ;;  %v612_v20 = vsub.f32 %v3186_v12, %v4515_v18 }
  0x3b   :  { %4669 = vst [vmem:[#allocation18_spill] sm:$0xff] %v3207_v19  ;;  %4670 = vst [vmem:[#allocation19_spill] sm:$0xff] %v3222_v46  ;;  %2563 = vmatpush3.bf16.msra.mxu1 %v2562_v11  ;;  %v4509_v25 = vand.u32 4294901760, %v3207_v19  ;;  %v4537_v29 = vand.u32 4294901760, %v3200_v38  ;;  %v3232_v47 = vsub.f32 %v3183_v10, %v4538_v40  ;;  %v4511_v51 = vand.u32 4294901760, %v3222_v46  ;;  %2531 = vmatpush3.bf16.msra.mxu0 %v3211_v39 }
  0x3c   :  { %v606_v48 = vand.u32 4294901760, %v605_v42  ;;  %v493_v49 = vsub.f32 %v3194_v14, %v4514_v43  ;;  %v500_v50 = vsub.f32 %v3197_v17, %v4510_v44  ;;  %v613_v52 = vand.u32 4294901760, %v612_v20  ;;  %v3266_v44 = vld [vmem:[#allocation2 + $0x48] sm:$0xff] }
  0x3d   :  { %4671 = vst [vmem:[#allocation20_spill] sm:$0xff] %v3232_v47  ;;  %v619_v53 = vsub.f32 %v3207_v19, %v4509_v25  ;;  %v4512_v54 = vand.u32 4294901760, %v3232_v47  ;;  %v3249_v55 = vsub.f32 %v3200_v38, %v4537_v29  ;;  %v626_v63 = vsub.f32 %v3222_v46, %v4511_v51 }
  0x3e   :  { %v494_v58 = vand.u32 4294901760, %v493_v49  ;;  %v501_v59 = vand.u32 4294901760, %v500_v50  ;;  %v3258_v0 = vpack.c.bf16 %v413_v2, %v410_v61  ;;  %v2564_v11 = vpack.c.bf16 %v613_v52, %v606_v48 }
  0x3f   :  { %4672 = vst [vmem:[#allocation21_spill] sm:$0xff] %v3249_v55  ;;  %v620_v42 = vand.u32 4294901760, %v619_v53  ;;  %v507_v20 = vsub.f32 %v3232_v47, %v4512_v54  ;;  %v4513_v25 = vand.u32 4294901760, %v3249_v55  ;;  %v627_v50 = vand.u32 4294901760, %v626_v63 }
  0x40   :  { %v2566_v49 = vpack.c.bf16 %v501_v59, %v494_v58  ;;  %2533 = vmatprep.subr.bf16.mxu0 %v3258_v0  ;;  %v4536_v51 = vand.u32 4294901760, %v3251_v56  ;;  %v4535_v61 = vand.u32 4294901760, %v3253_v57  ;;  %2565 = vmatprep.subr.bf16.mxu1 %v2564_v11  ;;  %v3274_v52 = vpack.c.bf16 %v365_v9, %v362_v8 }
  0x41   :  { %v508_v2 = vand.u32 4294901760, %v507_v20  ;;  %v514_v48 = vsub.f32 %v3249_v55, %v4513_v25  ;;  %v4534_v53 = vand.u32 4294901760, %v3260_v1  ;;  %v2568_v54 = vpack.c.bf16 %v627_v50, %v620_v42 }
  0x42   :  { %2567 = vmatpush3.bf16.msra.mxu1 %v2566_v49  ;;  %v3280_v58 = vsub.f32 %v3251_v56, %v4536_v51  ;;  %v3285_v59 = vsub.f32 %v3253_v57, %v4535_v61  ;;  %v4533_v63 = vand.u32 4294901760, %v3266_v44  ;;  %2535 = vmatpush3.bf16.msra.mxu0 %v3274_v52  ;;  %v4532_v35 = vand.u32 4294901760, %v3315_v36 }
  0x43   :  { %v515_v11 = vand.u32 4294901760, %v514_v48  ;;  %v3292_v8 = vsub.f32 %v3260_v1, %v4534_v53  ;;  %2569 = vmatprep.subr.bf16.mxu1 %v2568_v54  ;;  %v4682_v55 = vand.u32 4294901760, %v3200_v38  ;;  %v4688_v46 = vand.u32 4294901760, %v3253_v57 }
  0x44   :  { %4673 = vst [vmem:[#allocation22_spill] sm:$0xff] %v3280_v58  ;;  %4674 = vst [vmem:[#allocation23_spill] sm:$0xff] %v3285_v59  ;;  %v4518_v9 = vand.u32 4294901760, %v3280_v58  ;;  %v4520_v42 = vand.u32 4294901760, %v3285_v59  ;;  %v3299_v20 = vsub.f32 %v3266_v44, %v4533_v63 }
  0x45   :  { %4675 = vst [vmem:[#allocation24_spill] sm:$0xff] %v3292_v8  ;;  %v2570_v49 = vpack.c.bf16 %v515_v11, %v508_v2  ;;  %v4523_v50 = vand.u32 4294901760, %v3292_v8 }
  0x46   :  { %4676 = vst [vmem:[#allocation25_spill] sm:$0xff] %v3299_v20  ;;  %v633_v48 = vsub.f32 %v3280_v58, %v4518_v9  ;;  %v640_v54 = vsub.f32 %v3285_v59, %v4520_v42  ;;  %v4524_v25 = vand.u32 4294901760, %v3299_v20  ;;  %v50_v42 = vlaneseq  ;;  %v3401_v58 = vld [vmem:[#allocation2 + $0xf0] sm:$0xff]  ;;  %v3417_v59 = vld [vmem:[#allocation2 + $0x78] sm:$0xff] }
  0x47   :  { %2571 = vmatpush3.bf16.msra.mxu1 %v2570_v49  ;;  %v521_v43 = vsub.f32 %v3292_v8, %v4523_v50  ;;  %v3317_v49 = vld [vmem:[#allocation2 + $0xd8] sm:$0xff]  ;;  %v440_v38 = vand.u32 4294901760, %v3401_v58 }
  0x48   :  { %v634_v18 = vand.u32 4294901760, %v633_v48  ;;  %v641_v16 = vand.u32 4294901760, %v640_v54  ;;  %v528_v2 = vsub.f32 %v3299_v20, %v4524_v25  ;;  %v4530_v48 = vand.u32 4294901760, %v3317_v49  ;;  %v3321_v54 = vld [vmem:[#allocation2 + $0x50] sm:$0xff]  ;;  %v3323_v50 = vld [vmem:[#allocation2 + $0x58] sm:$0xff]  ;;  %v3351_v25 = vld [vmem:[#allocation2 + $0xe8] sm:$0xff] }
  0x49   :  { %v522_v11 = vand.u32 4294901760, %v521_v43  ;;  %v4529_v43 = vand.u32 4294901760, %v3321_v54  ;;  %v4542_v31 = vand.u32 4294901760, %v3351_v25  ;;  %v3447_v17 = vsub.f32 %v3401_v58, %v440_v38 }
  0x4a   :  { %v2572_v45 = vpack.c.bf16 %v641_v16, %v634_v18  ;;  %v529_v9 = vand.u32 4294901760, %v528_v2  ;;  %v4531_v16 = vand.u32 4294901760, %v3323_v50  ;;  %v3337_v18 = vand.u32 127, %v50_v42 }
  0x4b   :  { %v3379_v29 = vsub.f32 %v3351_v25, %v4542_v31  ;;  %v4574_v58 = vand.u32 4294901760, %v3447_v17 }
  0x4c   :  { %2573 = vmatprep.subr.bf16.mxu1 %v2572_v45  ;;  %v2574_v41 = vpack.c.bf16 %v529_v9, %v522_v11  ;;  %v3335_v45 = vsub.f32 %v3317_v49, %v4530_v48  ;;  %4677 = vst [vmem:[#allocation26_spill] sm:$0xff] %v3337_v18  ;;  %v3342_v9 = vsub.f32 %v3321_v54, %v4529_v43  ;;  %v3349_v11 = vld [vmem:[#allocation2 + $0xe0] sm:$0xff]  ;;  %v3359_v43 = vld [vmem:[#allocation2 + $0x68] sm:$0xff]  ;;  %vm173_vm0 = vcmp.lt.s32.totalorder %v3337_v18, 112 }
  0x4d   :  { %v3347_v2 = vsub.f32 %v3323_v50, %v4531_v16  ;;  %v4541_v42 = vand.u32 4294901760, %v3349_v11  ;;  %v4556_v63 = vand.u32 4294901760, %v3359_v43  ;;  %vm202_vm1 = vcmp.lt.s32.totalorder %v3337_v18, 127  ;;  %v3618_v18 = vld [vmem:[#allocation2 + $0x1f0] sm:$0xff] }
  0x4e   :  { %2575 = vmatpush3.bf16.msra.mxu1 %v2574_v41  ;;  %v3330_v41 = vsub.f32 %v3315_v36, %v4532_v35  ;;  %v4540_v32 = vand.u32 4294901760, %v3335_v45  ;;  %v4545_v48 = vand.u32 4294901760, %v3342_v9  ;;  %v4555_v35 = vand.u32 4294901760, %v3357_v30 }
  0x4f   :  { %v4550_v16 = vand.u32 4294901760, %v3347_v2  ;;  %v3374_v51 = vsub.f32 %v3349_v11, %v4541_v42  ;;  %v3395_v42 = vsub.f32 %v3359_v43, %v4556_v63  ;;  %v4678_v63 = vand.u32 4294901760, %v3170_v62 }
  0x50   :  { %v4539_v34 = vand.u32 4294901760, %v3330_v41  ;;  %v654_v61 = vsub.f32 %v3335_v45, %v4540_v32  ;;  %v535_v40 = vsub.f32 %v3342_v9, %v4545_v48  ;;  %v3390_v32 = vsub.f32 %v3357_v30, %v4555_v35  ;;  %v3403_v35 = vld [vmem:[#allocation2 + $0xf8] sm:$0xff] }
  0x51   :  { %v4681_v48 = vand.u32 4294901760, %v3183_v10 }
  0x52   :  { %v647_v53 = vsub.f32 %v3330_v41, %v4539_v34  ;;  %v542_v34 = vsub.f32 %v3347_v2, %v4550_v16  ;;  %v655_v21 = vand.u32 4294901760, %v654_v61  ;;  %v536_v20 = vand.u32 4294901760, %v535_v40  ;;  %v3415_v16 = vld [vmem:[#allocation2 + $0x70] sm:$0xff] }
  0x53   :  { %v4679_v61 = vand.u32 4294901760, %v3173_v4  ;;  %v4680_v40 = vand.u32 4294901760, %v3374_v51  ;;  %v3423_v47 = vpack.c.bf16 %v4682_v55, %v4681_v48  ;;  %v4684_v4 = vand.u32 4294901760, %v3379_v29 }
  0x54   :  { %v648_v31 = vand.u32 4294901760, %v647_v53  ;;  %v543_v8 = vand.u32 4294901760, %v542_v34  ;;  %v443_v55 = vand.u32 4294901760, %v3403_v35 }
  0x55   :  { %v3410_v53 = vpack.c.bf16 %v4679_v61, %v4678_v63  ;;  %v661_v34 = vsub.f32 %v3374_v51, %v4680_v40  ;;  %4683 = vst [vmem:[#allocation27_spill] sm:$0xff] %v3423_v47  ;;  %v668_v63 = vsub.f32 %v3379_v29, %v4684_v4  ;;  %v4686_v40 = vand.u32 4294901760, %v3395_v42 }
  0x56   :  { %v2576_v15 = vpack.c.bf16 %v655_v21, %v648_v31  ;;  %v2578_v62 = vpack.c.bf16 %v543_v8, %v536_v20  ;;  %v4685_v31 = vand.u32 4294901760, %v3390_v32  ;;  %v392_v4 = vand.u32 4294901760, %v3415_v16 }
  0x57   :  { %2537 = vmatprep.subr.bf16.mxu0 %v3410_v53  ;;  %v662_v61 = vand.u32 4294901760, %v661_v34  ;;  %v556_v10 = vsub.f32 %v3395_v42, %v4686_v40  ;;  %v669_v20 = vand.u32 4294901760, %v668_v63  ;;  %v4687_v34 = vand.u32 4294901760, %v3251_v56 }
  0x58   :  { %v549_v21 = vsub.f32 %v3390_v32, %v4685_v31  ;;  %2577 = vmatprep.subr.bf16.mxu1 %v2576_v15  ;;  %2539 = vmatpush3.bf16.msra.mxu0 %v3423_v47  ;;  %v395_v31 = vand.u32 4294901760, %v3417_v59  ;;  %v3450_v14 = vsub.f32 %v3403_v35, %v443_v55  ;;  %v4690_v63 = vand.u32 4294901760, %v3260_v1 }
  0x59   :  { %2579 = vmatpush3.bf16.msra.mxu1 %v2578_v62  ;;  %v3444_v40 = vpack.c.bf16 %v4688_v46, %v4687_v34  ;;  %v557_v19 = vand.u32 4294901760, %v556_v10  ;;  %v2580_v62 = vpack.c.bf16 %v669_v20, %v662_v61  ;;  %v3459_v56 = vsub.f32 %v3415_v16, %v392_v4 }
  0x5a   :  { %v550_v48 = vand.u32 4294901760, %v549_v21  ;;  %v4691_v21 = vand.u32 4294901760, %v3266_v44  ;;  %v3462_v46 = vsub.f32 %v3417_v59, %v395_v31  ;;  %v4573_v35 = vand.u32 4294901760, %v3450_v14 }
  0x5b   :  { %4689 = vst [vmem:[#allocation28_spill] sm:$0xff] %v3444_v40  ;;  %2541 = vmatprep.subr.bf16.mxu0 %v3444_v40  ;;  %2581 = vmatprep.subr.bf16.mxu1 %v2580_v62  ;;  %v4572_v44 = vand.u32 4294901760, %v3459_v56  ;;  %v4694_v20 = vand.u32 4294901760, %v3317_v49  ;;  %v675_v34 = vsub.f32 %v3447_v17, %v4574_v58  ;;  %v4713_v58 = vld [vmem:[#allocation17_spill] sm:$0xff] }
  0x5c   :  { %v3456_v47 = vpack.c.bf16 %v4691_v21, %v4690_v63  ;;  %v2582_v57 = vpack.c.bf16 %v557_v19, %v550_v48  ;;  %v4571_v1 = vand.u32 4294901760, %v3462_v46  ;;  %v4693_v19 = vand.u32 4294901760, %v3315_v36 }
  0x5d   :  { %v676_v49 = vand.u32 4294901760, %v675_v34 }
  0x5e   :  { %4692 = vst [vmem:[#allocation29_spill] sm:$0xff] %v3456_v47  ;;  %2543 = vmatpush3.bf16.msra.mxu0 %v3456_v47  ;;  %2583 = vmatpush3.bf16.msra.mxu1 %v2582_v57  ;;  %v3478_v48 = vpack.c.bf16 %v4694_v20, %v4693_v19  ;;  %v682_v57 = vsub.f32 %v3450_v14, %v4573_v35  ;;  %v4697_v19 = vand.u32 4294901760, %v3323_v50  ;;  %v4700_v50 = vand.u32 4294901760, %v3351_v25  ;;  %v4712_v35 = vld [vmem:[#allocation16_spill] sm:$0xff] }
  0x5f   :  { %v3520_v25 = vpack.c.bf16 %v443_v55, %v440_v38  ;;  %v3607_v55 = vld [vmem:[#allocation2 + $0x1e8] sm:$0xff] }
  0x60   :  { %4695 = vst [vmem:[#allocation30_spill] sm:$0xff] %v3478_v48  ;;  %2545 = vmatprep.subr.bf16.mxu0 %v3478_v48  ;;  %v4722_v38 = vld [vmem:[#allocation22_spill] sm:$0xff] }
  0x61   :  { %4705 = vst [vmem:[#allocation34_spill] sm:$0xff] %v3520_v25 }
  0x9c   :  { %v170_v8 = vpop.permute.xlu1 %169 }
  0x9d   :  { %v166_v15 = vpop.permute.xlu0 %165 }
  0xa0   :  { %v172_v61 = vpop.permute.xlu1 %171 }
  0xa1   :  { %v174_v16 = vsel %vm173_vm0, %v170_v8, %v172_v61  ;;  %v177_v59 = vsel %vm173_vm0, %v172_v61, %v166_v15  ;;  %v168_v10 = vpop.permute.xlu0 %167  ;;  %v4696_v61 = vand.u32 4294901760, %v3321_v54  ;;  %v4699_v54 = vand.u32 4294901760, %v3349_v11 }
  0xa2   :  { %v183_v62 = vcombine.low %v174_v16, %v177_v59  ;;  %v175_v63 = vsel %vm173_vm0, %v168_v10, %v170_v8  ;;  %v176_v21 = vsel %vm173_vm0, %v166_v15, %v168_v10  ;;  %v563_v8 = vsub.f32 %v3459_v56, %v4572_v44 }
  0xa3   :  { %v182_v36 = vcombine.low %v176_v21, %v175_v63  ;;  %v3495_v20 = vpack.c.bf16 %v4697_v19, %v4696_v61  ;;  %v683_v16 = vand.u32 4294901760, %v682_v57  ;;  %v570_v15 = vsub.f32 %v3462_v46, %v4571_v1 }
  0xa4   :  { %v564_v10 = vand.u32 4294901760, %v563_v8  ;;  %v3509_v34 = vpack.c.bf16 %v4700_v50, %v4699_v54  ;;  %v4702_v61 = vand.u32 4294901760, %v3357_v30  ;;  %v4703_v57 = vand.u32 4294901760, %v3359_v43 }
  0xa5   :  { %4698 = vst [vmem:[#allocation31_spill] sm:$0xff] %v3495_v20  ;;  %v186_v59 = vmax.f32 %v3081_v5, %v182_v36  ;;  %2547 = vmatpush3.bf16.msra.mxu0 %v3495_v20  ;;  %v2584_v63 = vpack.c.bf16 %v683_v16, %v676_v49  ;;  %v571_v21 = vand.u32 4294901760, %v570_v15  ;;  %v187_v1 = vmax.f32 %v3079_v3, %v183_v62  ;;  %v4723_v3 = vld [vmem:[#allocation23_spill] sm:$0xff]  ;;  %v3620_v49 = vld [vmem:[#allocation2 + $0x1f8] sm:$0xff] }
  0xa6   :  { %4701 = vst [vmem:[#allocation32_spill] sm:$0xff] %v3509_v34  ;;  %v3515_v19 = vpack.c.bf16 %v4703_v57, %v4702_v61  ;;  %2549 = vmatprep.subr.bf16.mxu0 %v3509_v34  ;;  %v3523_v43 = vpack.c.bf16 %v395_v31, %v392_v4  ;;  %v2588_v62 = vpack.c.bf16 %v3104_v23, %v3102_v22  ;;  %v3596_v31 = vld [vmem:[#allocation2 + $0x150] sm:$0xff]  ;;  %4727 = vst [vmem:[#allocation22_spill] sm:$0xff] %v3620_v49 }
  0xa7   :  { %194 = vrot.lane.b32.xlu0 %v186_v59, %s3019_s1  ;;  %v190_v36 = vcombine.high %v186_v59, %v186_v59  ;;  %2585 = vmatprep.subr.bf16.mxu1 %v2584_v63  ;;  %v2586_v11 = vpack.c.bf16 %v571_v21, %v564_v10  ;;  %v191_v30 = vcombine.high %v187_v1, %v187_v1 }
  0xa8   :  { %4704 = vst [vmem:[#allocation33_spill] sm:$0xff] %v3515_v19  ;;  %v2604_v5 = vpack.c.bf16 %v4723_v3, %v4722_v38 }
  0xa9   :  { %196 = vrot.lane.b32.xlu1 %v190_v36, %s3019_s1  ;;  %2551 = vmatpush3.bf16.msra.mxu0 %v3515_v19 }
  0xaa   :  { %2587 = vmatpush3.bf16.msra.mxu1 %v2586_v11  ;;  %2553 = vmatprep.subr.bf16.mxu0 %v3520_v25 }
  0xab   :  { %198 = vrot.lane.b32.xlu0 %v187_v1, %s3019_s1  ;;  %2621 = vmatprep.subr.bf16.mxu1 %v3167_v60 }
  0xad   :  { %200 = vrot.lane.b32.xlu1 %v191_v30, %s3019_s1  ;;  %2555 = vmatpush3.bf16.msra.mxu0 %v3523_v43 }
  0xae   :  { %2589 = vmatprep.subr.bf16.mxu0 %v2588_v62 }
 0x119   :  { %v195_v16 = vpop.permute.xlu0 %194 }
 0x11b   :  { %v197_v15 = vpop.permute.xlu1 %196 }
 0x11c   :  { %v205_v54 = vsel %vm202_vm1, %v195_v16, %v197_v15 }
 0x11d   :  { %v199_v10 = vpop.permute.xlu0 %198 }
 0x11e   :  { %v204_v50 = vsel %vm202_vm1, %v197_v15, %v199_v10 }
 0x11f   :  { %v211_v63 = vcombine.low %v205_v54, %v204_v50  ;;  %v201_v21 = vpop.permute.xlu1 %200 }
 0x120   :  { %v203_v61 = vsel %vm202_vm1, %v199_v10, %v201_v21  ;;  %v206_v57 = vsel %vm202_vm1, %v201_v21, %v195_v16 }
 0x121   :  { %v3542_v36 = vmax.f32 %v186_v59, %v211_v63  ;;  %v212_v11 = vcombine.low %v203_v61, %v206_v57  ;;  %v2590_v61 = vpack.c.bf16 %v3110_v26, %v3107_v24 }
 0x123   :  { %4706 = vst [vmem:[#allocation35_spill] sm:$0xff] %v3542_v36  ;;  %v3544_v30 = vmax.f32 %v187_v1, %v212_v11  ;;  %223 = vrot.lane.b32.xlu0 %v3542_v36, %s3020_s2  ;;  %v3549_v62 = vcombine.high %v3542_v36, %v3542_v36  ;;  %v3552_v44 = vand.u32 4294901760, %v3542_v36  ;;  %v2592_v11 = vpack.c.bf16 %v3116_v28, %v3113_v27 }
 0x125   :  { %4707 = vst [vmem:[#allocation36_spill] sm:$0xff] %v3544_v30  ;;  %4708 = vst [vmem:[#allocation37_spill] sm:$0xff] %v3549_v62  ;;  %225 = vrot.lane.b32.xlu1 %v3549_v62, %s3020_s2  ;;  %v3556_v15 = vand.u32 4294901760, %v3549_v62  ;;  %v3560_v59 = vsub.f32 %v3542_v36, %v3552_v44  ;;  %v3566_v1 = vcombine.high %v3544_v30, %v3544_v30  ;;  %v3614_v36 = vld [vmem:[#allocation2 + $0x168] sm:$0xff] }
 0x126   :  { %4709 = vst [vmem:[#allocation38_spill] sm:$0xff] %v3552_v44 }
 0x127   :  { %686 = vmatprep.mubr.f32.mxu1 %v3556_v15  ;;  %227 = vrot.lane.b32.xlu0 %v3544_v30, %s3020_s2  ;;  %4710 = vst [vmem:[#allocation39_spill] sm:$0xff] %v3566_v1  ;;  %v446_v16 = vsub.f32 %v3549_v62, %v3556_v15  ;;  %v4575_v10 = vand.u32 4294901760, %v3560_v59  ;;  %v4729_v30 = vld [vmem:[#allocation25_spill] sm:$0xff] }
 0x128   :  { %688 = vmatmul.mubr.f32.vlgmr.msra.gmra.mrb[0].mxu1 %v3552_v44 }
 0x129   :  { %2623 = vmatpush3.bf16.msra.mxu1 %v3179_v7  ;;  %229 = vrot.lane.b32.xlu1 %v3566_v1, %s3020_s2  ;;  %v447_v54 = vand.u32 4294901760, %v446_v16  ;;  %v454_v50 = vsub.f32 %v3560_v59, %v4575_v10  ;;  %v4730_v1 = vand.u32 4294901760, %v3596_v31  ;;  %v3635_v10 = vld [vmem:[#allocation2 + $0x170] sm:$0xff] }
 0x12a   :  { %2625 = vmatprep.subr.bf16.mxu1 %v3188_v13  ;;  %4732 = vst [vmem:[#allocation23_spill] sm:$0xff] %v3635_v10 }
 0x12b   :  { %930 = vmatprep.mubr.f32.mxu1 %v447_v54  ;;  %v448_v63 = vsub.f32 %v446_v16, %v447_v54  ;;  %v455_v57 = vand.u32 4294901760, %v454_v50  ;;  %v2594_v54 = vpack.c.bf16 %v3131_v37, %v3125_v33  ;;  %v4711_v50 = vld [vmem:[#allocation27_spill] sm:$0xff] }
 0x12c   :  { %4716 = vst [vmem:[#allocation27_spill] sm:$0xff] %v3596_v31 }
 0x12d   :  { %2627 = vmatpush3.bf16.msra.mxu1 %v3211_v39  ;;  %v449_v21 = vand.u32 4294901760, %v448_v63  ;;  %v2596_v63 = vpack.c.bf16 %v3186_v12, %v3177_v6 }
 0x12e   :  { %2629 = vmatprep.subr.bf16.mxu1 %v3258_v0 }
 0x12f   :  { %450 = vmatprep.mubr.f32.mxu0 %v449_v21  ;;  %v2598_v21 = vpack.c.bf16 %v4713_v58, %v4712_v35 }
 0x130   :  { %456 = vmatmul.mubr.f32.vlgmr.msra.gmra.mrb[0].mxu0 %v455_v57  ;;  %v4715_v57 = vld [vmem:[#allocation19_spill] sm:$0xff] }
 0x131   :  { %2591 = vmatpush3.bf16.msra.mxu0 %v2590_v61  ;;  %2631 = vmatpush3.bf16.msra.mxu1 %v3274_v52  ;;  %v4714_v61 = vld [vmem:[#allocation18_spill] sm:$0xff] }
 0x132   :  { %823 = vmatprep.mubr.f32.mxu0 %v446_v16  ;;  %2593 = vmatprep.subr.bf16.mxu0 %v2592_v11  ;;  %v2600_v8 = vpack.c.bf16 %v4715_v57, %v4714_v61  ;;  %v3598_v16 = vld [vmem:[#allocation2 + $0x158] sm:$0xff]  ;;  %4721 = vst [vmem:[#allocation18_spill] sm:$0xff] %v3607_v55 }
 0x133   :  { %2633 = vmatprep.subr.bf16.mxu1 %v3410_v53  ;;  %4717 = vst [vmem:[#allocation16_spill] sm:$0xff] %v3598_v16  ;;  %v4718_v11 = vld [vmem:[#allocation20_spill] sm:$0xff] }
 0x134   :  { %4725 = vst [vmem:[#allocation20_spill] sm:$0xff] %v3614_v36 }
 0x135   :  { %2595 = vmatpush3.bf16.msra.mxu0 %v2594_v54  ;;  %2635 = vmatpush3.bf16.msra.mxu1 %v4711_v50  ;;  %v4719_v54 = vld [vmem:[#allocation21_spill] sm:$0xff] }
 0x136   :  { %2597 = vmatprep.subr.bf16.mxu0 %v2596_v63  ;;  %2637 = vmatprep.subr.bf16.mxu1 %v3444_v40  ;;  %v2602_v4 = vpack.c.bf16 %v4719_v54, %v4718_v11  ;;  %v3605_v63 = vld [vmem:[#allocation2 + $0x1e0] sm:$0xff]  ;;  %4726 = vst [vmem:[#allocation21_spill] sm:$0xff] %v3618_v18  ;;  %v3637_v40 = vld [vmem:[#allocation2 + $0x178] sm:$0xff] }
 0x137   :  { %4720 = vst [vmem:[#allocation17_spill] sm:$0xff] %v3605_v63  ;;  %4733 = vst [vmem:[#allocation40_spill] sm:$0xff] %v3637_v40 }
 0x139   :  { %2599 = vmatpush3.bf16.msra.mxu0 %v2598_v21  ;;  %2639 = vmatpush3.bf16.msra.mxu1 %v3456_v47  ;;  %v3612_v21 = vld [vmem:[#allocation2 + $0x160] sm:$0xff]  ;;  %v4731_v47 = vand.u32 4294901760, %v3598_v16 }
 0x13a   :  { %2601 = vmatprep.subr.bf16.mxu0 %v2600_v8  ;;  %2641 = vmatprep.subr.bf16.mxu1 %v3478_v48  ;;  %4724 = vst [vmem:[#allocation19_spill] sm:$0xff] %v3612_v21  ;;  %v4728_v8 = vld [vmem:[#allocation24_spill] sm:$0xff]  ;;  %v3628_v48 = vsub.f32 %v3596_v31, %v4730_v1  ;;  %v4734_v31 = vand.u32 4294901760, %v3605_v63  ;;  %v4741_v1 = vand.u32 4294901760, %v3618_v18 }
 0x13b   :  { %v2606_v44 = vpack.c.bf16 %v4729_v30, %v4728_v8  ;;  %v3633_v62 = vsub.f32 %v3598_v16, %v4731_v47  ;;  %v4736_v16 = vand.u32 4294901760, %v3607_v55  ;;  %v3675_v30 = vld [vmem:[#allocation2 + $0x188] sm:$0xff] }
 0x13c   :  { %v3647_v47 = vsub.f32 %v3605_v63, %v4734_v31  ;;  %v4737_v31 = vpack.c.bf16 %v3335_v45, %v3330_v41 }
 0x13d   :  { %2603 = vmatpush3.bf16.msra.mxu0 %v2602_v4  ;;  %2643 = vmatpush3.bf16.msra.mxu1 %v3495_v20  ;;  %v3652_v8 = vsub.f32 %v3607_v55, %v4736_v16  ;;  %v3663_v20 = vld [vmem:[#allocation2 + $0x180] sm:$0xff]  ;;  %v4738_v16 = vand.u32 4294901760, %v3612_v21  ;;  %v4742_v55 = vand.u32 4294901760, %v3620_v49 }
 0x13e   :  { %2605 = vmatprep.subr.bf16.mxu0 %v2604_v5  ;;  %2645 = vmatprep.subr.bf16.mxu1 %v3509_v34  ;;  %4735 = vst [vmem:[#allocation41_spill] sm:$0xff] %v3647_v47 }
 0x13f   :  { %v3668_v5 = vsub.f32 %v3612_v21, %v4738_v16  ;;  %v3685_v63 = vsub.f32 %v3620_v49, %v4742_v55  ;;  %v4743_v16 = vand.u32 4294901760, %v3628_v48  ;;  %v4744_v21 = vand.u32 4294901760, %v3633_v62 }
 0x140   :  { %v4747_v55 = vand.u32 4294901760, %v3637_v40 }
 0x141   :  { %2607 = vmatpush3.bf16.msra.mxu0 %v2606_v44  ;;  %2647 = vmatpush3.bf16.msra.mxu1 %v3515_v19  ;;  %v4739_v44 = vand.u32 4294901760, %v3614_v36  ;;  %v3733_v19 = vld [vmem:[#allocation2 + $0x190] sm:$0xff] }
 0x142   :  { %2609 = vmatprep.subr.bf16.mxu0 %v4737_v31  ;;  %2649 = vmatprep.subr.bf16.mxu1 %v3520_v25  ;;  %v3680_v31 = vsub.f32 %v3618_v18, %v4741_v1  ;;  %v3691_v25 = vpack.c.bf16 %v4744_v21, %v4743_v16  ;;  %v4746_v18 = vand.u32 4294901760, %v3635_v10  ;;  %v3707_v49 = vsub.f32 %v3637_v40, %v4747_v55  ;;  %v3751_v55 = vld [vmem:[#allocation2 + $0x198] sm:$0xff] }
 0x143   :  { %v3673_v4 = vsub.f32 %v3614_v36, %v4739_v44  ;;  %v3693_v44 = vld [vmem:[#allocation2 + $0x100] sm:$0xff]  ;;  %v3695_v36 = vld [vmem:[#allocation2 + $0x108] sm:$0xff]  ;;  %v4749_v21 = vpack.c.bf16 %v3347_v2, %v3342_v9  ;;  %v4750_v1 = vpack.c.bf16 %v3379_v29, %v3374_v51 }
 0x144   :  { %4745 = vst [vmem:[#allocation43_spill] sm:$0xff] %v3691_v25  ;;  %v3702_v34 = vsub.f32 %v3635_v10, %v4746_v18  ;;  %4748 = vst [vmem:[#allocation44_spill] sm:$0xff] %v3707_v49  ;;  %v4751_v25 = vand.u32 4294901760, %v3647_v47  ;;  %v4754_v18 = vand.u32 4294901760, %v3560_v59  ;;  %v4758_v10 = vpack.c.bf16 %v3395_v42, %v3390_v32 }
 0x145   :  { %4740 = vst [vmem:[#allocation42_spill] sm:$0xff] %v3673_v4  ;;  %2611 = vmatpush3.bf16.msra.mxu0 %v4749_v21  ;;  %2651 = vmatpush3.bf16.msra.mxu1 %v3523_v43  ;;  %v4752_v21 = vand.u32 4294901760, %v3652_v8  ;;  %v4761_v47 = vand.u32 4294901760, %v3680_v31 }
 0x146   :  { %2613 = vmatprep.subr.bf16.mxu0 %v4750_v1  ;;  %2685 = vmatprep.subr.bf16.mxu1 %v3167_v60  ;;  %v4760_v60 = vand.u32 4294901760, %v3104_v23  ;;  %v4767_v23 = vand.u32 4294901760, %v3675_v30 }
 0x147   :  { %v3725_v40 = vpack.c.bf16 %v4752_v21, %v4751_v25  ;;  %v4755_v25 = vand.u32 4294901760, %v3668_v5  ;;  %v4756_v21 = vand.u32 4294901760, %v3673_v4 }
 0x148   :  { %934 = vmatmul.mubr.f32.vlgmr.msra.gmra.mrb[2].mxu1 %v4754_v18  ;;  %v4759_v18 = vand.u32 4294901760, %v3102_v22 }
 0x149   :  { %4753 = vst [vmem:[#allocation45_spill] sm:$0xff] %v3725_v40  ;;  %v3741_v16 = vpack.c.bf16 %v4756_v21, %v4755_v25  ;;  %2615 = vmatpush3.bf16.msra.mxu0 %v4758_v10  ;;  %2687 = vmatpush3.bf16.msra.mxu1 %v3179_v7  ;;  %v4762_v40 = vand.u32 4294901760, %v3685_v63  ;;  %v4764_v10 = vpack.c.bf16 %v3450_v14, %v3447_v17  ;;  %v4765_v7 = vand.u32 4294901760, %v3663_v20 }
 0x14a   :  { %v2652_v1 = vpack.c.bf16 %v4760_v60, %v4759_v18  ;;  %1204 = vmatprep.mubr.f32.mxu1 %v3556_v15  ;;  %v3771_v60 = vsub.f32 %v3675_v30, %v4767_v23  ;;  %v4769_v25 = vand.u32 4294901760, %v3702_v34  ;;  %2689 = vmatprep.subr.bf16.mxu1 %v3188_v13  ;;  %v4772_v21 = vand.u32 4294901760, %v3693_v44 }
 0x14b   :  { %4757 = vst [vmem:[#allocation46_spill] sm:$0xff] %v3741_v16  ;;  %v3757_v4 = vpack.c.bf16 %v4762_v40, %v4761_v47  ;;  %2617 = vmatprep.subr.bf16.mxu0 %v4764_v10  ;;  %v3766_v22 = vsub.f32 %v3663_v20, %v4765_v7  ;;  %v4770_v40 = vand.u32 4294901760, %v3707_v49  ;;  %v4774_v10 = vand.u32 4294901760, %v3695_v36 }
 0x14c   :  { %4768 = vst [vmem:[#allocation49_spill] sm:$0xff] %v3771_v60  ;;  %v3783_v18 = vsub.f32 %v3693_v44, %v4772_v21  ;;  %v4777_v13 = vand.u32 4294901760, %v3107_v24  ;;  %v4780_v23 = vand.u32 4294901760, %v3116_v28  ;;  %v4611_v49 = vand.u32 4294901760, %v3771_v60 }
 0x14d   :  { %4763 = vst [vmem:[#allocation47_spill] sm:$0xff] %v3757_v4  ;;  %4766 = vst [vmem:[#allocation48_spill] sm:$0xff] %v3766_v22  ;;  %v3777_v47 = vpack.c.bf16 %v4770_v40, %v4769_v25  ;;  %v3788_v7 = vsub.f32 %v3695_v36, %v4774_v10  ;;  %v3791_v4 = vld [vmem:[#allocation2 + $0x110] sm:$0xff]  ;;  %v4776_v25 = vpack.c.bf16 %v3462_v46, %v3459_v56  ;;  %2691 = vmatpush3.bf16.msra.mxu1 %v3211_v39  ;;  %v3834_v39 = vld [vmem:[#allocation2 + $0x1a0] sm:$0xff] }
 0x14e   :  { %4773 = vst [vmem:[#allocation51_spill] sm:$0xff] %v3783_v18  ;;  %v4778_v40 = vand.u32 4294901760, %v3110_v26  ;;  %2693 = vmatprep.subr.bf16.mxu1 %v3258_v0  ;;  %v4779_v10 = vand.u32 4294901760, %v3113_v27  ;;  %v4612_v16 = vand.u32 4294901760, %v3766_v22  ;;  %v4781_v26 = vand.u32 4294901760, %v3733_v19  ;;  %v3817_v0 = vld [vmem:[#allocation2 + $0x118] sm:$0xff] }
 0x14f   :  { %4771 = vst [vmem:[#allocation50_spill] sm:$0xff] %v3777_v47  ;;  %4775 = vst [vmem:[#allocation52_spill] sm:$0xff] %v3788_v7  ;;  %2619 = vmatpush3.bf16.msra.mxu0 %v4776_v25  ;;  %v4613_v25 = vand.u32 4294901760, %v3791_v4  ;;  %v4783_v27 = vand.u32 4294901760, %v3751_v55 }
 0x150   :  { %v2654_v21 = vpack.c.bf16 %v4778_v40, %v4777_v13  ;;  %2653 = vmatprep.subr.bf16.mxu0 %v2652_v1  ;;  %v2656_v47 = vpack.c.bf16 %v4780_v23, %v4779_v10  ;;  %v3815_v1 = vsub.f32 %v3733_v19, %v4781_v26  ;;  %v4785_v23 = vand.u32 4294901760, %v3125_v33 }
 0x151   :  { %v3823_v28 = vsub.f32 %v3751_v55, %v4783_v27  ;;  %v4786_v13 = vand.u32 4294901760, %v3131_v37  ;;  %v4787_v10 = vand.u32 4294901760, %v3177_v6  ;;  %v4788_v26 = vand.u32 4294901760, %v3186_v12  ;;  %2695 = vmatpush3.bf16.msra.mxu1 %v3274_v52  ;;  %v3878_v37 = vld [vmem:[#allocation2 + $0x120] sm:$0xff] }
 0x152   :  { %4782 = vst [vmem:[#allocation53_spill] sm:$0xff] %v3815_v1  ;;  %826 = vmatmul.mubr.f32.vlgmr.msra.gmra.mrb[2].mxu0 %v3560_v59  ;;  %v3836_v59 = vld [vmem:[#allocation2 + $0x1a8] sm:$0xff]  ;;  %v1446_v33 = vsub.f32 %v3771_v60, %v4611_v49  ;;  %v3849_v6 = vsub.f32 %v3791_v4, %v4613_v25  ;;  %2697 = vmatprep.subr.bf16.mxu1 %v3410_v53  ;;  %v4790_v12 = vand.u32 4294901760, %v3783_v18  ;;  %v4793_v53 = vand.u32 4294901760, %v4713_v58 }
 0x153   :  { %4784 = vst [vmem:[#allocation54_spill] sm:$0xff] %v3823_v28  ;;  %2655 = vmatpush3.bf16.msra.mxu0 %v2654_v21  ;;  %1100 = vmatprep.mubr.f32.mxu0 %v3556_v15  ;;  %v2658_v40 = vpack.c.bf16 %v4786_v13, %v4785_v23  ;;  %v2660_v24 = vpack.c.bf16 %v4788_v26, %v4787_v10  ;;  %v4792_v26 = vand.u32 4294901760, %v4712_v35  ;;  %v4797_v27 = vand.u32 4294901760, %v4719_v54  ;;  %v3887_v54 = vld [vmem:[#allocation2 + $0x128] sm:$0xff] }
 0x154   :  { %2657 = vmatprep.subr.bf16.mxu0 %v2656_v47  ;;  %v1439_v15 = vsub.f32 %v3766_v22, %v4612_v16  ;;  %4789 = vst [vmem:[#allocation55_spill] sm:$0xff] %v3849_v6  ;;  %v1327_v52 = vsub.f32 %v3783_v18, %v4790_v12  ;;  %v4791_v47 = vand.u32 4294901760, %v3788_v7  ;;  %v4794_v12 = vand.u32 4294901760, %v4714_v61 }
 0x155   :  { %v2662_v49 = vpack.c.bf16 %v4793_v53, %v4792_v26  ;;  %v4795_v16 = vand.u32 4294901760, %v4715_v57  ;;  %v4798_v13 = vand.u32 4294901760, %v4722_v38  ;;  %v4799_v10 = vand.u32 4294901760, %v4723_v3  ;;  %2699 = vmatpush3.bf16.msra.mxu1 %v4711_v50  ;;  %v3889_v38 = vld [vmem:[#allocation2 + $0x1b0] sm:$0xff] }
 0x156   :  { %v1334_v21 = vsub.f32 %v3788_v7, %v4791_v47  ;;  %v4796_v47 = vand.u32 4294901760, %v4718_v11  ;;  %v1440_v58 = vand.u32 4294901760, %v1439_v15  ;;  %v1447_v35 = vand.u32 4294901760, %v1446_v33  ;;  %v4802_v3 = vld [vmem:[#allocation28_spill] sm:$0xff] }
 0x157   :  { %2659 = vmatpush3.bf16.msra.mxu0 %v2658_v40  ;;  %v2664_v25 = vpack.c.bf16 %v4795_v16, %v4794_v12  ;;  %v2668_v40 = vpack.c.bf16 %v4799_v10, %v4798_v13  ;;  %v4800_v57 = vand.u32 4294901760, %v3817_v0  ;;  %2701 = vmatprep.subr.bf16.mxu1 %v4802_v3  ;;  %v4803_v16 = vld [vmem:[#allocation24_spill] sm:$0xff]  ;;  %v4805_v13 = vld [vmem:[#allocation25_spill] sm:$0xff]  ;;  %v1328_v15 = vand.u32 4294901760, %v1327_v52 }
 0x158   :  { %v2666_v23 = vpack.c.bf16 %v4797_v27, %v4796_v47  ;;  %2661 = vmatprep.subr.bf16.mxu0 %v2660_v24  ;;  %v4804_v27 = vand.u32 4294901760, %v4803_v16  ;;  %v4806_v50 = vand.u32 4294901760, %v4805_v13  ;;  %v1335_v33 = vand.u32 4294901760, %v1334_v21  ;;  %v3913_v21 = vld [vmem:[#allocation2 + $0x1b8] sm:$0xff] }
 0x159   :  { %v3885_v11 = vsub.f32 %v3817_v0, %v4800_v57  ;;  %v4807_v10 = vand.u32 4294901760, %v3815_v1  ;;  %v4808_v53 = vand.u32 4294901760, %v3823_v28  ;;  %v4809_v47 = vand.u32 4294901760, %v3834_v39 }
 0x15a   :  { %v2670_v24 = vpack.c.bf16 %v4806_v50, %v4804_v27  ;;  %v4811_v3 = vand.u32 4294901760, %v3836_v59  ;;  %v4813_v27 = vand.u32 4294901760, %v3330_v41  ;;  %v4814_v13 = vand.u32 4294901760, %v3335_v45 }
 0x15b   :  { %4801 = vst [vmem:[#allocation56_spill] sm:$0xff] %v3885_v11  ;;  %v1453_v26 = vsub.f32 %v3815_v1, %v4807_v10  ;;  %v1460_v12 = vsub.f32 %v3823_v28, %v4808_v53  ;;  %v3905_v57 = vsub.f32 %v3834_v39, %v4809_v47  ;;  %2663 = vmatpush3.bf16.msra.mxu0 %v2662_v49  ;;  %v4815_v10 = vand.u32 4294901760, %v3342_v9  ;;  %v4817_v28 = vld [vmem:[#allocation29_spill] sm:$0xff]  ;;  %v4840_v1 = vld [vmem:[#allocation34_spill] sm:$0xff] }
 0x15c   :  { %v3910_v16 = vsub.f32 %v3836_v59, %v4811_v3  ;;  %v2672_v50 = vpack.c.bf16 %v4814_v13, %v4813_v27  ;;  %v4816_v53 = vand.u32 4294901760, %v3347_v2  ;;  %v4617_v61 = vand.u32 4294901760, %v3887_v54  ;;  %2703 = vmatpush3.bf16.msra.mxu1 %v4817_v28  ;;  %2665 = vmatprep.subr.bf16.mxu0 %v2664_v25  ;;  %v4821_v13 = vld [vmem:[#allocation30_spill] sm:$0xff] }
 0x15d   :  { %4810 = vst [vmem:[#allocation28_spill] sm:$0xff] %v3905_v57  ;;  %v4616_v3 = vand.u32 4294901760, %v3889_v38  ;;  %v4818_v49 = vand.u32 4294901760, %v3374_v51  ;;  %v4819_v41 = vand.u32 4294901760, %v3379_v29  ;;  %v3934_v45 = vpack.c.bf16 %v1447_v35, %v1440_v58  ;;  %2705 = vmatprep.subr.bf16.mxu1 %v4821_v13  ;;  %v3952_v35 = vld [vmem:[#allocation2 + $0x130] sm:$0xff]  ;;  %v3963_v13 = vld [vmem:[#allocation2 + $0x1c0] sm:$0xff] }
 0x15e   :  { %4812 = vst [vmem:[#allocation24_spill] sm:$0xff] %v3910_v16  ;;  %v3923_v47 = vpack.c.bf16 %v4816_v53, %v4815_v10  ;;  %v4820_v9 = vand.u32 4294901760, %v3849_v6  ;;  %v4618_v27 = vand.u32 4294901760, %v3885_v11  ;;  %v4822_v28 = vand.u32 4294901760, %v3390_v32  ;;  %v3954_v53 = vld [vmem:[#allocation2 + $0x138] sm:$0xff] }
 0x15f   :  { %v3932_v52 = vpack.c.bf16 %v4819_v41, %v4818_v49  ;;  %v4823_v25 = vand.u32 4294901760, %v3395_v42  ;;  %v3949_v29 = vpack.c.bf16 %v1335_v33, %v1328_v15  ;;  %v1454_v10 = vand.u32 4294901760, %v1453_v26  ;;  %v3965_v15 = vld [vmem:[#allocation2 + $0x1c8] sm:$0xff]  ;;  %2667 = vmatpush3.bf16.msra.mxu0 %v2666_v23 }
 0x160   :  { %v3939_v2 = vsub.f32 %v3849_v6, %v4820_v9  ;;  %v4623_v58 = vand.u32 4294901760, %v3913_v21  ;;  %v1461_v49 = vand.u32 4294901760, %v1460_v12  ;;  %v4628_v41 = vand.u32 4294901760, %v3905_v57  ;;  %2669 = vmatprep.subr.bf16.mxu0 %v2668_v40 }
 0x161   :  { %v3947_v51 = vpack.c.bf16 %v4823_v25, %v4822_v28  ;;  %v4824_v32 = vand.u32 4294901760, %v3878_v37  ;;  %v4826_v33 = vand.u32 4294901760, %v3447_v17  ;;  %v4827_v26 = vand.u32 4294901760, %v3450_v14  ;;  %v4832_v17 = vld [vmem:[#allocation31_spill] sm:$0xff] }
 0x162   :  { %v4828_v12 = vand.u32 4294901760, %v3459_v56  ;;  %v4829_v25 = vand.u32 4294901760, %v3462_v46  ;;  %v3987_v23 = vsub.f32 %v3889_v38, %v4616_v3  ;;  %2707 = vmatpush3.bf16.msra.mxu1 %v4832_v17  ;;  %v1342_v14 = vand.u32 4294901760, %v3939_v2  ;;  %v4834_v3 = vld [vmem:[#allocation39_spill] sm:$0xff] }
 0x163   :  { %v3961_v42 = vsub.f32 %v3878_v37, %v4824_v32  ;;  %v3971_v28 = vpack.c.bf16 %v4827_v26, %v4826_v33  ;;  %v3982_v32 = vsub.f32 %v3887_v54, %v4617_v61  ;;  %v1348_v56 = vsub.f32 %v3885_v11, %v4618_v27  ;;  %v3996_v26 = vld [vmem:[#allocation2 + $0x140] sm:$0xff]  ;;  %v4011_v27 = vld [vmem:[#allocation2 + $0x1d0] sm:$0xff]  ;;  %v4013_v33 = vld [vmem:[#allocation2 + $0x1d8] sm:$0xff]  ;;  %2671 = vmatpush3.bf16.msra.mxu0 %v2670_v24 }
 0x164   :  { %v3977_v9 = vpack.c.bf16 %v4829_v25, %v4828_v12  ;;  %4831 = vst [vmem:[#allocation30_spill] sm:$0xff] %v3987_v23  ;;  %v3998_v12 = vld [vmem:[#allocation2 + $0x148] sm:$0xff]  ;;  %v4833_v25 = vld [vmem:[#allocation32_spill] sm:$0xff]  ;;  %v4002_v61 = vand.u32 4294901760, %v4834_v3  ;;  %v4007_v40 = vsub.f32 %v3913_v21, %v4623_v58  ;;  %4835 = vst [vmem:[#allocation31_spill] sm:$0xff] %v4013_v33  ;;  %v2752_v46 = vpack.c.bf16 %v1461_v49, %v1454_v10 }
 0x165   :  { %4825 = vst [vmem:[#allocation25_spill] sm:$0xff] %v3961_v42  ;;  %4830 = vst [vmem:[#allocation29_spill] sm:$0xff] %v3982_v32  ;;  %2709 = vmatprep.subr.bf16.mxu1 %v4833_v25  ;;  %v1467_v25 = vsub.f32 %v3905_v57, %v4628_v41  ;;  %v4836_v11 = vand.u32 4294901760, %v3910_v16  ;;  %v4837_v10 = vld [vmem:[#allocation33_spill] sm:$0xff]  ;;  %2673 = vmatprep.subr.bf16.mxu0 %v2672_v50  ;;  %v4838_v49 = vand.u32 4294901760, %v3952_v35  ;;  %v1349_v2 = vand.u32 4294901760, %v1348_v56 }
 0x166   :  { %2711 = vmatpush3.bf16.msra.mxu1 %v4837_v10  ;;  %v4042_v10 = vsub.f32 %v4834_v3, %v4002_v61  ;;  %v4845_v50 = vand.u32 4294901760, %v3982_v32 }
 0x167   :  { %v1474_v6 = vsub.f32 %v3910_v16, %v4836_v11  ;;  %v4030_v41 = vsub.f32 %v3952_v35, %v4838_v49  ;;  %v4839_v11 = vand.u32 4294901760, %v3954_v53  ;;  %2713 = vmatprep.subr.bf16.mxu1 %v4840_v1  ;;  %v4841_v49 = vand.u32 4294901760, %v3963_v13  ;;  %2675 = vmatpush3.bf16.msra.mxu0 %v3923_v47 }
 0x168   :  { %v1468_v17 = vand.u32 4294901760, %v1467_v25  ;;  %v4844_v1 = vand.u32 4294901760, %v3961_v42  ;;  %v1362_v57 = vsub.f32 %v3982_v32, %v4845_v50  ;;  %2677 = vmatprep.subr.bf16.mxu0 %v3932_v52  ;;  %v4851_v52 = vand.u32 4294901760, %v4007_v40 }
 0x169   :  { %v4035_v24 = vsub.f32 %v3954_v53, %v4839_v11  ;;  %v4048_v7 = vsub.f32 %v3963_v13, %v4841_v49  ;;  %v4842_v11 = vand.u32 4294901760, %v3965_v15  ;;  %v1475_v16 = vand.u32 4294901760, %v1474_v6 }
 0x16a   :  { %v1355_v3 = vsub.f32 %v3961_v42, %v4844_v1  ;;  %v4846_v49 = vand.u32 4294901760, %v3987_v23  ;;  %v4848_v6 = vand.u32 4294901760, %v3998_v12  ;;  %2715 = vmatpush3.bf16.msra.mxu1 %v3523_v43  ;;  %v4849_v1 = vand.u32 4294901760, %v4011_v27 }
 0x16b   :  { %v4053_v58 = vsub.f32 %v3965_v15, %v4842_v11  ;;  %v4847_v11 = vand.u32 4294901760, %v3996_v26  ;;  %2749 = vmatprep.subr.bf16.mxu1 %v3934_v45  ;;  %v2754_v32 = vpack.c.bf16 %v1349_v2, %v1342_v14  ;;  %v4853_v42 = vand.u32 4294901760, %v3675_v30  ;;  %v4854_v45 = vld [vmem:[#allocation38_spill] sm:$0xff]  ;;  %2679 = vmatpush3.bf16.msra.mxu0 %v3947_v51 }
 0x16c   :  { %v1481_v18 = vsub.f32 %v3987_v23, %v4846_v49  ;;  %v4073_v25 = vsub.f32 %v3998_v12, %v4848_v6  ;;  %v4082_v49 = vsub.f32 %v4011_v27, %v4849_v1  ;;  %v1488_v6 = vsub.f32 %v4007_v40, %v4851_v52  ;;  %2681 = vmatprep.subr.bf16.mxu0 %v3971_v28 }
 0x16d   :  { %4843 = vst [vmem:[#allocation32_spill] sm:$0xff] %v4053_v58  ;;  %v4068_v56 = vsub.f32 %v3996_v26, %v4847_v11  ;;  %v4850_v11 = vand.u32 4294901760, %v4013_v33  ;;  %v4651_v47 = vand.u32 4294901760, %v4053_v58  ;;  %v4852_v1 = vand.u32 4294901760, %v3663_v20  ;;  %1206 = vmatmul.mubr.f32.vlgmr.msra.gmra.mrb[4].mxu1 %v4854_v45 }
 0x16e   :  { %v1356_v22 = vand.u32 4294901760, %v1355_v3  ;;  %v1363_v43 = vand.u32 4294901760, %v1362_v57  ;;  %v4649_v50 = vand.u32 4294901760, %v4073_v25  ;;  %2751 = vmatpush3.bf16.msra.mxu1 %v3949_v29  ;;  %1548 = vmatprep.mubr.f32.mxu1 %v4002_v61  ;;  %v4855_v20 = vand.u32 4294901760, %v4030_v41 }
 0x16f   :  { %v4087_v23 = vsub.f32 %v4013_v33, %v4850_v11  ;;  %v4100_v60 = vpack.c.bf16 %v4853_v42, %v4852_v1  ;;  %v2756_v11 = vpack.c.bf16 %v1475_v16, %v1468_v17  ;;  %v1482_v33 = vand.u32 4294901760, %v1481_v18  ;;  %2753 = vmatprep.subr.bf16.mxu1 %v2752_v46  ;;  %2683 = vmatpush3.bf16.msra.mxu0 %v3977_v9 }
 0x170   :  { %v4650_v52 = vand.u32 4294901760, %v4068_v56  ;;  %v1369_v30 = vsub.f32 %v4030_v41, %v4855_v20  ;;  %v4856_v16 = vand.u32 4294901760, %v4035_v24  ;;  %v4648_v51 = vand.u32 4294901760, %v4082_v49 }
 0x171   :  { %v4647_v18 = vand.u32 4294901760, %v4087_v23  ;;  %v4857_v57 = vand.u32 4294901760, %v4042_v10  ;;  %v1489_v42 = vand.u32 4294901760, %v1488_v6  ;;  %v4858_v14 = vand.u32 4294901760, %v4048_v7  ;;  %2717 = vmatprep.subr.bf16.mxu0 %v4100_v60 }
 0x172   :  { %v1376_v3 = vsub.f32 %v4035_v24, %v4856_v16  ;;  %v1502_v17 = vsub.f32 %v4053_v58, %v4651_v47  ;;  %v4859_v1 = vand.u32 4294901760, %v3693_v44  ;;  %v4860_v20 = vand.u32 4294901760, %v3695_v36  ;;  %2755 = vmatpush3.bf16.msra.mxu1 %v2754_v32  ;;  %1102 = vmatmul.mubr.f32.vlgmr.msra.gmra.mrb[4].mxu0 %v4854_v45  ;;  %v4934_v47 = vld [vmem:[#allocation30_spill] sm:$0xff] }
 0x173   :  { %v1310_v29 = vsub.f32 %v4042_v10, %v4857_v57  ;;  %v1495_v2 = vsub.f32 %v4048_v7, %v4858_v14  ;;  %v2758_v28 = vpack.c.bf16 %v1363_v43, %v1356_v22  ;;  %v4861_v46 = vand.u32 4294901760, %v3733_v19  ;;  %2757 = vmatprep.subr.bf16.mxu1 %v2756_v11 }
 0x174   :  { %v4130_v16 = vpack.c.bf16 %v4860_v20, %v4859_v1  ;;  %v4862_v6 = vand.u32 4294901760, %v3751_v55  ;;  %v1383_v14 = vsub.f32 %v4068_v56, %v4650_v52  ;;  %v1390_v44 = vsub.f32 %v4073_v25, %v4649_v50 }
 0x175   :  { %v1370_v36 = vand.u32 4294901760, %v1369_v30  ;;  %v1377_v9 = vand.u32 4294901760, %v1376_v3  ;;  %v1509_v19 = vsub.f32 %v4082_v49, %v4648_v51  ;;  %v1516_v55 = vsub.f32 %v4087_v23, %v4647_v18 }
 0x176   :  { %v4137_v57 = vpack.c.bf16 %v4862_v6, %v4861_v46  ;;  %v1311_v22 = vand.u32 4294901760, %v1310_v29  ;;  %v2760_v43 = vpack.c.bf16 %v1489_v42, %v1482_v33  ;;  %v1496_v1 = vand.u32 4294901760, %v1495_v2  ;;  %2719 = vmatpush3.bf16.msra.mxu0 %v4130_v16  ;;  %2759 = vmatpush3.bf16.msra.mxu1 %v2758_v28 }
 0x177   :  { %v1503_v20 = vand.u32 4294901760, %v1502_v17  ;;  %v4863_v32 = vand.u32 4294901760, %v3791_v4  ;;  %v4864_v30 = vand.u32 4294901760, %v3817_v0  ;;  %v1384_v46 = vand.u32 4294901760, %v1383_v14 }
 0x178   :  { %1312 = vmatprep.mubr.f32.mxu0 %v1311_v22  ;;  %v1391_v6 = vand.u32 4294901760, %v1390_v44  ;;  %v4865_v18 = vand.u32 4294901760, %v3628_v48  ;;  %v4866_v33 = vand.u32 4294901760, %v3633_v62  ;;  %2721 = vmatprep.subr.bf16.mxu0 %v4137_v57  ;;  %v2762_v4 = vpack.c.bf16 %v1377_v9, %v1370_v36  ;;  %v4869_v44 = vld [vmem:[#allocation41_spill] sm:$0xff] }
 0x179   :  { %v4157_v3 = vpack.c.bf16 %v4864_v30, %v4863_v32  ;;  %v4867_v0 = vand.u32 4294901760, %v3834_v39  ;;  %v4868_v45 = vand.u32 4294901760, %v3836_v59  ;;  %v1510_v2 = vand.u32 4294901760, %v1509_v19  ;;  %2761 = vmatprep.subr.bf16.mxu1 %v2760_v43 }
 0x17a   :  { %v1397_v11 = vsub.f32 %v3628_v48, %v4865_v18  ;;  %v1404_v29 = vsub.f32 %v3633_v62, %v4866_v33  ;;  %v1517_v17 = vand.u32 4294901760, %v1516_v55  ;;  %v2764_v14 = vpack.c.bf16 %v1503_v20, %v1496_v1  ;;  %2763 = vmatpush3.bf16.msra.mxu1 %v2762_v4  ;;  %v4877_v33 = vld [vmem:[#allocation42_spill] sm:$0xff] }
 0x17b   :  { %v4171_v42 = vpack.c.bf16 %v4868_v45, %v4867_v0  ;;  %v4870_v18 = vand.u32 4294901760, %v4869_v44  ;;  %v4871_v32 = vand.u32 4294901760, %v3652_v8  ;;  %v4872_v36 = vand.u32 4294901760, %v3878_v37  ;;  %2723 = vmatpush3.bf16.msra.mxu0 %v4157_v3 }
 0x17c   :  { %v4873_v39 = vand.u32 4294901760, %v3887_v54  ;;  %v2766_v59 = vpack.c.bf16 %v1391_v6, %v1384_v46  ;;  %v4874_v19 = vand.u32 4294901760, %v3889_v38  ;;  %v4875_v55 = vand.u32 4294901760, %v3913_v21  ;;  %2765 = vmatprep.subr.bf16.mxu1 %v2764_v14 }
 0x17d   :  { %v1523_v22 = vsub.f32 %v4869_v44, %v4870_v18  ;;  %v1530_v28 = vsub.f32 %v3652_v8, %v4871_v32  ;;  %v1398_v1 = vand.u32 4294901760, %v1397_v11  ;;  %v1405_v20 = vand.u32 4294901760, %v1404_v29  ;;  %2725 = vmatprep.subr.bf16.mxu0 %v4171_v42 }
 0x17e   :  { %v4183_v9 = vpack.c.bf16 %v4873_v39, %v4872_v36  ;;  %v4190_v43 = vpack.c.bf16 %v4875_v55, %v4874_v19  ;;  %v2768_v30 = vpack.c.bf16 %v1517_v17, %v1510_v2  ;;  %v4876_v37 = vand.u32 4294901760, %v3668_v5  ;;  %2767 = vmatpush3.bf16.msra.mxu1 %v2766_v59  ;;  %v4887_v19 = vld [vmem:[#allocation44_spill] sm:$0xff] }
 0x17f   :  { %v4878_v0 = vand.u32 4294901760, %v4877_v33  ;;  %v1524_v38 = vand.u32 4294901760, %v1523_v22  ;;  %v1531_v6 = vand.u32 4294901760, %v1530_v28  ;;  %v4879_v21 = vand.u32 4294901760, %v3680_v31 }
 0x180   :  { %v1411_v54 = vsub.f32 %v3668_v5, %v4876_v37  ;;  %v4880_v29 = vand.u32 4294901760, %v3685_v63  ;;  %2727 = vmatpush3.bf16.msra.mxu0 %v4183_v9  ;;  %v4881_v45 = vand.u32 4294901760, %v3952_v35  ;;  %v4882_v2 = vand.u32 4294901760, %v3954_v53  ;;  %2769 = vmatprep.subr.bf16.mxu1 %v2768_v30 }
 0x181   :  { %v1418_v46 = vsub.f32 %v4877_v33, %v4878_v0  ;;  %v1537_v11 = vsub.f32 %v3680_v31, %v4879_v21  ;;  %v2770_v18 = vpack.c.bf16 %v1405_v20, %v1398_v1  ;;  %v4883_v14 = vand.u32 4294901760, %v3963_v13  ;;  %2729 = vmatprep.subr.bf16.mxu0 %v4190_v43  ;;  %v4893_v0 = vld [vmem:[#allocation31_spill] sm:$0xff] }
 0x182   :  { %v1544_v4 = vsub.f32 %v3685_v63, %v4880_v29  ;;  %v4210_v17 = vpack.c.bf16 %v4882_v2, %v4881_v45  ;;  %v4884_v22 = vand.u32 4294901760, %v3965_v15  ;;  %v1412_v28 = vand.u32 4294901760, %v1411_v54 }
 0x183   :  { %v1419_v36 = vand.u32 4294901760, %v1418_v46  ;;  %v4886_v39 = vand.u32 4294901760, %v3702_v34  ;;  %v4888_v53 = vand.u32 4294901760, %v4887_v19  ;;  %v2772_v1 = vpack.c.bf16 %v1531_v6, %v1524_v38  ;;  %2771 = vmatpush3.bf16.msra.mxu1 %v2770_v18 }
 0x184   :  { %v4216_v32 = vpack.c.bf16 %v4884_v22, %v4883_v14  ;;  %v1538_v13 = vand.u32 4294901760, %v1537_v11  ;;  %v1545_v20 = vand.u32 4294901760, %v1544_v4  ;;  %2731 = vmatpush3.bf16.msra.mxu0 %v4210_v17  ;;  %v4889_v15 = vand.u32 4294901760, %v3996_v26  ;;  %v4896_v11 = vld [vmem:[#allocation36_spill] sm:$0xff]  ;;  %v4902_v14 = vld [vmem:[#allocation17_spill] sm:$0xff] }
 0x185   :  { %v1425_v35 = vsub.f32 %v3702_v34, %v4886_v39  ;;  %v1432_v55 = vsub.f32 %v4887_v19, %v4888_v53  ;;  %v4890_v59 = vand.u32 4294901760, %v3998_v12  ;;  %v4892_v54 = vand.u32 4294901760, %v4011_v27  ;;  %2773 = vmatprep.subr.bf16.mxu1 %v2772_v1  ;;  %v4898_v12 = vld [vmem:[#allocation27_spill] sm:$0xff]  ;;  %v4900_v27 = vld [vmem:[#allocation16_spill] sm:$0xff] }
 0x186   :  { %4885 = vst [vmem:[#allocation33_spill] sm:$0xff] %v4216_v32  ;;  %v4894_v46 = vand.u32 4294901760, %v4893_v0  ;;  %2733 = vmatprep.subr.bf16.mxu0 %v4216_v32  ;;  %v2774_v30 = vpack.c.bf16 %v1419_v36, %v1412_v28  ;;  %v4240_v29 = vand.u32 4294901760, %v4896_v11  ;;  %v2776_v26 = vpack.c.bf16 %v1545_v20, %v1538_v13  ;;  %v4904_v28 = vld [vmem:[#allocation18_spill] sm:$0xff]  ;;  %v4906_v53 = vld [vmem:[#allocation19_spill] sm:$0xff]  ;;  %v4908_v1 = vld [vmem:[#allocation20_spill] sm:$0xff] }
 0x187   :  { %v4230_v37 = vpack.c.bf16 %v4890_v59, %v4889_v15  ;;  %v1426_v38 = vand.u32 4294901760, %v1425_v35  ;;  %v1433_v6 = vand.u32 4294901760, %v1432_v55  ;;  %v4899_v4 = vand.u32 4294901760, %v4898_v12  ;;  %v4910_v59 = vld [vmem:[#allocation21_spill] sm:$0xff]  ;;  %v4912_v0 = vld [vmem:[#allocation22_spill] sm:$0xff] }
 0x188   :  { %v4236_v21 = vpack.c.bf16 %v4894_v46, %v4892_v54  ;;  %4897 = vst [vmem:[#allocation41_spill] sm:$0xff] %v4240_v29  ;;  %v4901_v45 = vand.u32 4294901760, %v4900_v27  ;;  %2775 = vmatpush3.bf16.msra.mxu1 %v2774_v30  ;;  %v4903_v22 = vand.u32 4294901760, %v4902_v14  ;;  %v4905_v36 = vand.u32 4294901760, %v4904_v28  ;;  %v4920_v14 = vld [vmem:[#allocation49_spill] sm:$0xff]  ;;  %v4921_v28 = vld [vmem:[#allocation51_spill] sm:$0xff] }
 0x189   :  { %4891 = vst [vmem:[#allocation34_spill] sm:$0xff] %v4230_v37  ;;  %2735 = vmatpush3.bf16.msra.mxu0 %v4230_v37  ;;  %v2778_v18 = vpack.c.bf16 %v1433_v6, %v1426_v38  ;;  %v4258_v35 = vsub.f32 %v4896_v11, %v4240_v29  ;;  %2777 = vmatprep.subr.bf16.mxu1 %v2776_v26  ;;  %v4907_v55 = vand.u32 4294901760, %v4906_v53  ;;  %v4909_v13 = vand.u32 4294901760, %v4908_v1  ;;  %v4914_v38 = vld [vmem:[#allocation23_spill] sm:$0xff]  ;;  %v4916_v26 = vld [vmem:[#allocation40_spill] sm:$0xff]  ;;  %v4923_v1 = vld [vmem:[#allocation53_spill] sm:$0xff] }
 0x18a   :  { %4895 = vst [vmem:[#allocation38_spill] sm:$0xff] %v4236_v21  ;;  %v4247_v2 = vpack.c.bf16 %v4901_v45, %v4899_v4  ;;  %2737 = vmatprep.subr.bf16.mxu0 %v4236_v21  ;;  %v4254_v39 = vpack.c.bf16 %v4905_v36, %v4903_v22  ;;  %v4911_v54 = vand.u32 4294901760, %v4910_v59  ;;  %v4913_v46 = vand.u32 4294901760, %v4912_v0  ;;  %v4922_v36 = vld [vmem:[#allocation52_spill] sm:$0xff] }
 0x18b   :  { %v4265_v20 = vpack.c.bf16 %v4909_v13, %v4907_v55  ;;  %v4652_v15 = vand.u32 4294901760, %v4258_v35  ;;  %v4915_v6 = vand.u32 4294901760, %v4914_v38  ;;  %v4917_v12 = vand.u32 4294901760, %v4916_v26  ;;  %v4924_v13 = vld [vmem:[#allocation54_spill] sm:$0xff]  ;;  %v4928_v38 = vld [vmem:[#allocation56_spill] sm:$0xff] }
 0x18c   :  { %2779 = vmatpush3.bf16.msra.mxu1 %v2778_v18  ;;  %v4274_v30 = vpack.c.bf16 %v4913_v46, %v4911_v54  ;;  %v4918_v27 = vand.u32 4294901760, %v4042_v10  ;;  %v4919_v18 = vld [vmem:[#allocation48_spill] sm:$0xff]  ;;  %v2782_v53 = vpack.c.bf16 %v4922_v36, %v4921_v28  ;;  %v2784_v59 = vpack.c.bf16 %v4924_v13, %v4923_v1  ;;  %v4925_v54 = vld [vmem:[#allocation26_spill] sm:$0xff]  ;;  %v4927_v46 = vld [vmem:[#allocation55_spill] sm:$0xff] }
 0x18d   :  { %2739 = vmatpush3.bf16.msra.mxu0 %v4247_v2  ;;  %2813 = vmatprep.subr.bf16.mxu1 %v4100_v60  ;;  %v4282_v4 = vpack.c.bf16 %v4917_v12, %v4915_v6  ;;  %v1316_v45 = vsub.f32 %v4258_v35, %v4652_v15  ;;  %v2780_v22 = vpack.c.bf16 %v4920_v14, %v4919_v18  ;;  %v4301_v0 = vadd.s32 128, %v4925_v54  ;;  %v4929_v26 = vld [vmem:[#allocation28_spill] sm:$0xff] }
 0x18e   :  { %2741 = vmatprep.subr.bf16.mxu0 %v4254_v39  ;;  %v2786_v6 = vpack.c.bf16 %v4928_v38, %v4927_v46  ;;  %v4930_v12 = vld [vmem:[#allocation24_spill] sm:$0xff]  ;;  %vm231_vm2 = vcmp.lt.s32.totalorder %v4925_v54, 16  ;;  %v4324_v52 = vadd.s32 256, %v4925_v54  ;;  %v2792_v15 = vpack.c.bf16 %v4007_v40, %v4934_v47 }
 0x18f   :  { %1550 = vmatmul.mubr.f32.vlgmr.msra.gmra.mrb[6].mxu1 %v4240_v29  ;;  %v1317_v55 = vand.u32 4294901760, %v1316_v45  ;;  %4926 = vst [vmem:[#allocation42_spill] sm:$0xff] %v4301_v0  ;;  %v4656_v45 = vand.u32 31, %v4301_v0  ;;  %vm256_vm7 = vcmp.lt.s32.totalorder %v4925_v54, 1 }
 0x190   :  { %2815 = vmatpush3.bf16.msra.mxu1 %v4130_v16  ;;  %1792 = vmatprep.mubr.f32.mxu1 %v4918_v27  ;;  %v2788_v27 = vpack.c.bf16 %v4930_v12, %v4929_v26 }
 0x191   :  { %2743 = vmatpush3.bf16.msra.mxu0 %v4265_v20  ;;  %2817 = vmatprep.subr.bf16.mxu1 %v4137_v57  ;;  %vm104_vm3 = vcmp.lt.s32.totalorder %v4656_v45, 16  ;;  %v2794_v45 = vpack.c.bf16 %v4035_v24, %v4030_v41 }
 0x192   :  { %2745 = vmatprep.subr.bf16.mxu0 %v4274_v30 }
 0x194   :  { %2819 = vmatpush3.bf16.msra.mxu1 %v4157_v3 }
 0x195   :  { %2747 = vmatpush3.bf16.msra.mxu0 %v4282_v4  ;;  %2821 = vmatprep.subr.bf16.mxu1 %v4171_v42 }
 0x196   :  { %2781 = vmatprep.subr.bf16.mxu0 %v2780_v22  ;;  %v4312_v22 = vadd.s32 384, %v4925_v54 }
 0x198   :  { %1318 = vmatmul.mubr.f32.vlgmr.msra.gmra.mrb[6].mxu0 %v1317_v55  ;;  %2823 = vmatpush3.bf16.msra.mxu1 %v4183_v9  ;;  %4931 = vst [vmem:[#allocation44_spill] sm:$0xff] %v4312_v22  ;;  %v4933_v55 = vld [vmem:[#allocation29_spill] sm:$0xff]  ;;  %v4662_v50 = vand.u32 31, %v4312_v22 }
 0x199   :  { %2783 = vmatpush3.bf16.msra.mxu0 %v2782_v53  ;;  %1685 = vmatprep.mubr.f32.mxu0 %v4042_v10  ;;  %v224_v53 = vpop.permute.xlu0 %223  ;;  %v4932_v10 = vld [vmem:[#allocation25_spill] sm:$0xff] }
 0x19a   :  { %2785 = vmatprep.subr.bf16.mxu0 %v2784_v59  ;;  %2825 = vmatprep.subr.bf16.mxu1 %v4190_v43  ;;  %v2790_v51 = vpack.c.bf16 %v4933_v55, %v4932_v10  ;;  %v4660_v59 = vand.u32 31, %v4925_v54  ;;  %vm106_vm5 = vcmp.lt.s32.totalorder %v4662_v50, 16  ;;  %v4938_v50 = vld [vmem:[#allocation39_spill] sm:$0xff] }
 0x19c   :  { %2827 = vmatpush3.bf16.msra.mxu1 %v4210_v17  ;;  %vm103_vm4 = vcmp.lt.s32.totalorder %v4660_v59, 16  ;;  %v4937_v59 = vld [vmem:[#allocation35_spill] sm:$0xff] }
 0x19d   :  { %2787 = vmatpush3.bf16.msra.mxu0 %v2786_v6  ;;  %2829 = vmatprep.subr.bf16.mxu1 %v4216_v32  ;;  %v226_v6 = vpop.permute.xlu1 %225 }
 0x19e   :  { %2789 = vmatprep.subr.bf16.mxu0 %v2788_v27  ;;  %v234_v29 = vsel %vm231_vm2, %v224_v53, %v226_v6  ;;  %v4935_v27 = vld [vmem:[#allocation37_spill] sm:$0xff] }
 0x19f   :  { %v4332_v0 = vsel %vm104_vm3, %v4935_v27, %v234_v29  ;;  %v2796_v27 = vpack.c.bf16 %v4053_v58, %v4048_v7  ;;  %v4939_v58 = vand.u32 31, %v4324_v52 }
 0x1a0   :  { %4936 = vst [vmem:[#allocation31_spill] sm:$0xff] %v4332_v0  ;;  %2831 = vmatpush3.bf16.msra.mxu1 %v4230_v37  ;;  %250 = vrot.lane.b32.xlu1 %v4332_v0, %s3021_s19 }
 0x1a1   :  { %2791 = vmatpush3.bf16.msra.mxu0 %v2790_v51  ;;  %v228_v51 = vpop.permute.xlu0 %227  ;;  %2833 = vmatprep.subr.bf16.mxu1 %v4236_v21  ;;  %v230_v29 = vpop.permute.xlu1 %229  ;;  %vm105_vm6 = vcmp.lt.s32.totalorder %v4939_v58, 16  ;;  %v2804_v58 = vpack.c.bf16 %v3652_v8, %v4869_v44  ;;  %v2810_v8 = vpack.c.bf16 %v4887_v19, %v3702_v34  ;;  %v4942_v44 = vand.u32 4294901760, %v4920_v14 }
 0x1a2   :  { %2793 = vmatprep.subr.bf16.mxu0 %v2792_v15  ;;  %v232_v37 = vsel %vm231_vm2, %v228_v51, %v230_v29  ;;  %v235_v0 = vsel %vm231_vm2, %v230_v29, %v224_v53  ;;  %v2798_v15 = vpack.c.bf16 %v4073_v25, %v4068_v56  ;;  %v233_v21 = vsel %vm231_vm2, %v226_v6, %v228_v51 }
 0x1a3   :  { %v4351_v22 = vsel %vm103_vm4, %v4937_v59, %v235_v0  ;;  %v4354_v32 = vsel %vm106_vm5, %v4938_v50, %v232_v37  ;;  %v2800_v50 = vpack.c.bf16 %v4087_v23, %v4082_v49  ;;  %v4369_v37 = vsel %vm105_vm6, %v4896_v11, %v233_v21 }
 0x1a4   :  { %2835 = vmatpush3.bf16.msra.mxu1 %v4247_v2  ;;  %248 = vrot.lane.b32.xlu0 %v4351_v22, %s3021_s19  ;;  %v2802_v0 = vpack.c.bf16 %v3633_v62, %v3628_v48  ;;  %v2808_v48 = vpack.c.bf16 %v3685_v63, %v3680_v31  ;;  %v4940_v62 = vand.u32 4294901760, %v4258_v35  ;;  %v4943_v63 = vand.u32 4294901760, %v4921_v28 }
 0x1a5   :  { %2795 = vmatpush3.bf16.msra.mxu0 %v2794_v45  ;;  %254 = vrot.lane.b32.xlu1 %v4354_v32, %s3021_s19  ;;  %v2806_v45 = vpack.c.bf16 %v4877_v33, %v3668_v5  ;;  %v4941_v5 = vand.u32 4294901760, %v4919_v18  ;;  %v4944_v31 = vand.u32 4294901760, %v4922_v36  ;;  %v4945_v34 = vand.u32 4294901760, %v4923_v1  ;;  %v4955_v1 = vld [vmem:[#allocation33_spill] sm:$0xff] }
 0x1a6   :  { %2797 = vmatprep.subr.bf16.mxu0 %v2796_v27  ;;  %2837 = vmatprep.subr.bf16.mxu1 %v4254_v39  ;;  %v4948_v21 = vand.u32 4294901760, %v4928_v38  ;;  %v4950_v18 = vand.u32 4294901760, %v4930_v12  ;;  %v4953_v28 = vand.u32 4294901760, %v4934_v47  ;;  %v4958_v38 = vld [vmem:[#allocation34_spill] sm:$0xff] }
 0x1a7   :  { %v2844_v33 = vpack.c.bf16 %v4942_v44, %v4941_v5  ;;  %v4962_v47 = vld [vmem:[#allocation38_spill] sm:$0xff] }
 0x1a8   :  { %2839 = vmatpush3.bf16.msra.mxu1 %v4265_v20  ;;  %252 = vrot.lane.b32.xlu0 %v4369_v37, %s3021_s19 }
 0x1a9   :  { %2799 = vmatpush3.bf16.msra.mxu0 %v2798_v15  ;;  %2841 = vmatprep.subr.bf16.mxu1 %v4274_v30 }
 0x1aa   :  { %2801 = vmatprep.subr.bf16.mxu0 %v2800_v50 }
 0x1ac   :  { %2843 = vmatpush3.bf16.msra.mxu1 %v4282_v4 }
 0x1ad   :  { %2803 = vmatpush3.bf16.msra.mxu0 %v2802_v0  ;;  %2877 = vmatprep.subr.bf16.mxu1 %v4100_v60  ;;  %v2846_v60 = vpack.c.bf16 %v4944_v31, %v4943_v63 }
 0x1ae   :  { %2805 = vmatprep.subr.bf16.mxu0 %v2804_v58  ;;  %v4975_v58 = vand.u32 31, %v4925_v54 }
 0x1af   :  { %1796 = vmatmul.mubr.f32.vlgmr.msra.gmra.mrb[8].mxu1 %v4940_v62 }
 0x1b0   :  { %2879 = vmatpush3.bf16.msra.mxu1 %v4130_v16  ;;  %2066 = vmatprep.mubr.f32.mxu1 %v4002_v61  ;;  %v4946_v16 = vand.u32 4294901760, %v4924_v13  ;;  %v4956_v13 = vand.u32 4294901760, %v4030_v41  ;;  %v4965_v41 = vand.u32 4294901760, %v4082_v49  ;;  %v4970_v49 = vld [vmem:[#allocation46_spill] sm:$0xff] }
 0x1b1   :  { %2807 = vmatpush3.bf16.msra.mxu0 %v2806_v45  ;;  %2881 = vmatprep.subr.bf16.mxu1 %v4137_v57  ;;  %v4947_v57 = vand.u32 4294901760, %v4927_v46  ;;  %v111_v45 = vand.u32 1, %v4975_v58 }
 0x1b2   :  { %2809 = vmatprep.subr.bf16.mxu0 %v2808_v48  ;;  %v2848_v19 = vpack.c.bf16 %v4946_v16, %v4945_v34  ;;  %v4976_v48 = vand.u32 31, %v4324_v52 }
 0x1b3   :  { %v2850_v11 = vpack.c.bf16 %v4948_v21, %v4947_v57  ;;  %vm155_vm9 = vcmp.eq.s32.totalorder %v111_v45, 0 }
 0x1b4   :  { %2883 = vmatpush3.bf16.msra.mxu1 %v4157_v3  ;;  %v4949_v3 = vand.u32 4294901760, %v4929_v26  ;;  %v4959_v26 = vand.u32 4294901760, %v4048_v7  ;;  %v4967_v7 = vld [vmem:[#allocation43_spill] sm:$0xff]  ;;  %v125_v62 = vand.u32 1, %v4976_v48 }
 0x1b5   :  { %2811 = vmatpush3.bf16.msra.mxu0 %v2810_v8  ;;  %2885 = vmatprep.subr.bf16.mxu1 %v4171_v42  ;;  %v4951_v42 = vand.u32 4294901760, %v4932_v10  ;;  %v4964_v10 = vand.u32 4294901760, %v4073_v25  ;;  %v4969_v25 = vld [vmem:[#allocation41_spill] sm:$0xff]  ;;  %v4977_v8 = vld [vmem:[#allocation44_spill] sm:$0xff] }
 0x1b6   :  { %2845 = vmatprep.subr.bf16.mxu0 %v2844_v33  ;;  %v2852_v14 = vpack.c.bf16 %v4950_v18, %v4949_v3  ;;  %v4978_v5 = vand.u32 31, %v4977_v8  ;;  %vm157_vm10 = vcmp.eq.s32.totalorder %v125_v62, 0 }
 0x1b8   :  { %1688 = vmatmul.mubr.f32.vlgmr.msra.gmra.mrb[8].mxu0 %v4258_v35  ;;  %2887 = vmatpush3.bf16.msra.mxu1 %v4183_v9  ;;  %v4954_v9 = vand.u32 4294901760, %v4007_v40  ;;  %v4963_v40 = vand.u32 4294901760, %v4068_v56  ;;  %v4968_v56 = vld [vmem:[#allocation45_spill] sm:$0xff]  ;;  %v132_v44 = vand.u32 1, %v4978_v5 }
 0x1b9   :  { %2847 = vmatpush3.bf16.msra.mxu0 %v2846_v60  ;;  %1962 = vmatprep.mubr.f32.mxu0 %v4002_v61  ;;  %v4952_v61 = vand.u32 4294901760, %v4933_v55  ;;  %v4979_v60 = vld [vmem:[#allocation31_spill] sm:$0xff] }
 0x1ba   :  { %2849 = vmatprep.subr.bf16.mxu0 %v2848_v19  ;;  %2889 = vmatprep.subr.bf16.mxu1 %v4190_v43  ;;  %v2856_v36 = vpack.c.bf16 %v4954_v9, %v4953_v28  ;;  %v4957_v43 = vand.u32 4294901760, %v4035_v24  ;;  %v2862_v55 = vpack.c.bf16 %v4964_v10, %v4963_v40  ;;  %v4966_v24 = vand.u32 4294901760, %v4087_v23  ;;  %v4971_v23 = vld [vmem:[#allocation47_spill] sm:$0xff] }
 0x1bb   :  { %v2854_v35 = vpack.c.bf16 %v4952_v61, %v4951_v42  ;;  %vm158_vm11 = vcmp.eq.s32.totalorder %v132_v44, 0 }
 0x1bc   :  { %2891 = vmatpush3.bf16.msra.mxu1 %v4210_v17  ;;  %v2858_v46 = vpack.c.bf16 %v4957_v43, %v4956_v13  ;;  %v4960_v17 = vld [vmem:[#allocation32_spill] sm:$0xff]  ;;  %v2864_v59 = vpack.c.bf16 %v4966_v24, %v4965_v41 }
 0x1bd   :  { %2851 = vmatpush3.bf16.msra.mxu0 %v2850_v11  ;;  %2893 = vmatprep.subr.bf16.mxu1 %v4955_v1  ;;  %v4961_v12 = vand.u32 4294901760, %v4960_v17 }
 0x1be   :  { %2853 = vmatprep.subr.bf16.mxu0 %v2852_v14  ;;  %v4980_v14 = vld [vmem:[#allocation15_spill] sm:$0xff] }
 0x1bf   :  { %v2860_v53 = vpack.c.bf16 %v4961_v12, %v4959_v26 }
 0x1c0   :  { %2895 = vmatpush3.bf16.msra.mxu1 %v4958_v38 }
 0x1c1   :  { %2855 = vmatpush3.bf16.msra.mxu0 %v2854_v35  ;;  %2897 = vmatprep.subr.bf16.mxu1 %v4962_v47  ;;  %v4981_v35 = vld [vmem:[#allocation14_spill] sm:$0xff] }
 0x1c2   :  { %2857 = vmatprep.subr.bf16.mxu0 %v2856_v36 }
 0x1c4   :  { %2899 = vmatpush3.bf16.msra.mxu1 %v4247_v2  ;;  %v4972_v2 = vld [vmem:[#allocation50_spill] sm:$0xff] }
 0x1c5   :  { %2859 = vmatpush3.bf16.msra.mxu0 %v2858_v46  ;;  %2901 = vmatprep.subr.bf16.mxu1 %v4254_v39 }
 0x1c6   :  { %2861 = vmatprep.subr.bf16.mxu0 %v2860_v53 }
 0x1c8   :  { %2903 = vmatpush3.bf16.msra.mxu1 %v4265_v20 }
 0x1c9   :  { %2863 = vmatpush3.bf16.msra.mxu0 %v2862_v55  ;;  %2905 = vmatprep.subr.bf16.mxu1 %v4274_v30 }
 0x1ca   :  { %2865 = vmatprep.subr.bf16.mxu0 %v2864_v59 }
 0x1cc   :  { %2907 = vmatpush3.bf16.msra.mxu1 %v4282_v4  ;;  %v4973_v4 = vld [vmem:[#allocation42_spill] sm:$0xff] }
 0x1cd   :  { %2867 = vmatpush3.bf16.msra.mxu0 %v4967_v7  ;;  %v4974_v15 = vand.u32 31, %v4973_v4 }
 0x1ce   :  { %2869 = vmatprep.subr.bf16.mxu0 %v4968_v56 }
 0x1cf   :  { %2068 = vmatmul.mubr.f32.vlgmr.msra.gmra.mrb[10].mxu1 %v4969_v25  ;;  %v118_v50 = vand.u32 1, %v4974_v15 }
 0x1d1   :  { %2871 = vmatpush3.bf16.msra.mxu0 %v4970_v49  ;;  %vm156_vm8 = vcmp.eq.s32.totalorder %v118_v50, 0 }
 0x1d2   :  { %2873 = vmatprep.subr.bf16.mxu0 %v4971_v23 }
 0x1d5   :  { %2875 = vmatpush3.bf16.msra.mxu0 %v4972_v2 }
 0x1d8   :  { %1964 = vmatmul.mubr.f32.vlgmr.msra.gmra.mrb[10].mxu0 %v4969_v25 }
 0x1fb   :  { %v2171_v39 = vpop.f32.mrb[0].mxu1 }
 0x1fc   :  { %v2172_v20 = vpop.f32.mrb[1].mxu1 }
 0x1fd   :  { %v2173_v6 = vadd.f32 %v2172_v20, %v2171_v39 }
 0x203   :  { %v2136_v30 = vpop.f32.mrb[0].mxu0 }
 0x204   :  { %v2137_v51 = vpop.f32.mrb[1].mxu0 }
 0x205   :  { %v2138_v29 = vadd.f32 %v2137_v51, %v2136_v30 }
 0x207   :  { %v690_v27 = vadd.f32 %v2173_v6, %v2138_v29 }
 0x212   :  { %v251_v0 = vpop.permute.xlu1 %250 }
 0x216   :  { %v249_v33 = vpop.permute.xlu0 %248 }
 0x217   :  { %v259_v63 = vsel %vm256_vm7, %v249_v33, %v251_v0  ;;  %v255_v31 = vpop.permute.xlu1 %254 }
 0x218   :  { %v270_v34 = vsel %vm156_vm8, %v4979_v60, %v259_v63  ;;  %v260_v16 = vsel %vm256_vm7, %v255_v31, %v249_v33 }
 0x219   :  { %v269_v19 = vsel %vm155_vm9, %v4351_v22, %v260_v16 }
 0x21a   :  { %v277_v52 = vcombine.low %v269_v19, %v270_v34  ;;  %v253_v57 = vpop.permute.xlu0 %252 }
 0x21b   :  { %v257_v21 = vsel %vm256_vm7, %v253_v57, %v255_v31  ;;  %v258_v11 = vsel %vm256_vm7, %v251_v0, %v253_v57  ;;  %v2241_v28 = vpop.f32.mrb[2].mxu1 }
 0x21c   :  { %v271_v3 = vsel %vm157_vm10, %v4369_v37, %v258_v11  ;;  %v272_v18 = vsel %vm158_vm11, %v4354_v32, %v257_v21  ;;  %v281_v42 = vsub.f32 %v4980_v14, %v277_v52  ;;  %v2242_v9 = vpop.f32.mrb[3].mxu1 }
 0x21d   :  { %v278_v61 = vcombine.low %v271_v3, %v272_v18  ;;  %v2243_v36 = vadd.f32 %v2242_v9, %v2241_v28 }
 0x21e   :  { %283 = vst [vmem:[#allocation8] sm:$0xff] %v281_v42 }
 0x21f   :  { %v282_v22 = vsub.f32 %v4981_v35, %v278_v61 }
 0x221   :  { %284 = vst [vmem:[#allocation8 + $0x8] sm:$0xff] %v282_v22 }
 0x225   :  { %v2206_v1 = vpop.f32.mrb[2].mxu0 }
 0x226   :  { %v2207_v13 = vpop.f32.mrb[3].mxu0 }
 0x227   :  { %v2208_v43 = vadd.f32 %v2207_v13, %v2206_v1 }
 0x229   :  { %v828_v46 = vadd.f32 %v2208_v43, %v690_v27 }
 0x22b   :  { %v936_v54 = vadd.f32 %v2243_v36, %v828_v46 }
 0x22c   :  { %2973 = shalt.err (!%p2970_p6)
}
 0x22d   :  { %s2974_s25 = scalar_lea.hbm %s4508_s4, 256 }
 0x22e   :  { %p2975_p7 = scmp.ne.s32.totalorder %s4508_s4, %s2974_s25  ;;  %p2978_p8 = scmp.lt.u32.totalorder %s2974_s25, %s4508_s4 }
 0x230   :  { %p2980_p9 = pnand %p2978_p8, %p2975_p7 }
 0x232   :  { %2983 = shalt.err (!%p2980_p9)
}
 0x233   :  { %2093 = dma.vmem_to_hbm [thread:$0]  %s2091_s21, 256, %s4508_s4, [#allocation9]  }
 0x234   :  { %s3023_s4 = smov [#allocation7]  }
 0x235   :  { %s2080_s6 = sshll.u32 %s3023_s4, 4  ;;  %s2081_s6 = int_to_ptr.vmem [resolvable:$true] %s2080_s6 }
 0x236   :  { %s2984_s7 = scalar_lea.vmem %s2081_s6, 64  ;;  %p2989_p11 = scmp.lt.s32.totalorder %s2081_s6, %s2081_s6 }
 0x237   :  { %p2985_p10 = scmp.ne.s32.totalorder %s2081_s6, %s2984_s7  ;;  %p2990_p12 = scmp.lt.s32.totalorder %s2984_s7, %s2984_s7 }
 0x239   :  { %p2991_p13 = por %p2990_p12, %p2989_p11 }
 0x23b   :  { %p2992_p0 = pnand %p2991_p13, %p2985_p10 }
 0x240   :  { %v2311_v32 = vpop.f32.mrb[4].mxu1 }
 0x241   :  { %v2312_v37 = vpop.f32.mrb[5].mxu1 }
 0x242   :  { %v2313_v38 = vadd.f32 %v2312_v37, %v2311_v32 }
 0x245   :  { %v2276_v26 = vpop.f32.mrb[4].mxu0 }
 0x246   :  { %v2277_v17 = vpop.f32.mrb[5].mxu0 }
 0x247   :  { %v2278_v12 = vadd.f32 %v2277_v17, %v2276_v26 }
 0x249   :  { %v1104_v53 = vadd.f32 %v2278_v12, %v936_v54 }
 0x24b   :  { %v1208_v47 = vadd.f32 %v2313_v38, %v1104_v53 }
 0x262   :  { %v2381_v40 = vpop.f32.mrb[6].mxu1 }
 0x263   :  { %v2382_v10 = vpop.f32.mrb[7].mxu1 }
 0x264   :  { %v2383_v55 = vadd.f32 %v2382_v10, %v2381_v40 }
 0x26b   :  { %v2346_v41 = vpop.f32.mrb[6].mxu0 }
 0x26c   :  { %v2347_v24 = vpop.f32.mrb[7].mxu0 }
 0x26d   :  { %v2348_v59 = vadd.f32 %v2347_v24, %v2346_v41 }
 0x26f   :  { %v1320_v7 = vadd.f32 %v2348_v59, %v1208_v47 }
 0x271   :  { %v1552_v56 = vadd.f32 %v2383_v55, %v1320_v7 }
 0x282   :  { %v2451_v25 = vpop.f32.mrb[8].mxu1 }
 0x283   :  { %v2452_v49 = vpop.f32.mrb[9].mxu1 }
 0x284   :  { %v2453_v23 = vadd.f32 %v2452_v49, %v2451_v25 }
 0x28b   :  { %v2416_v2 = vpop.f32.mrb[8].mxu0 }
 0x28c   :  { %v2417_v39 = vpop.f32.mrb[9].mxu0 }
 0x28d   :  { %v2418_v20 = vadd.f32 %v2417_v39, %v2416_v2 }
 0x28f   :  { %v1690_v6 = vadd.f32 %v2418_v20, %v1552_v56 }
 0x291   :  { %v1798_v30 = vadd.f32 %v2453_v23, %v1690_v6 }
 0x2a2   :  { %v2521_v51 = vpop.f32.mrb[10].mxu1 }
 0x2a3   :  { %v2522_v29 = vpop.f32.mrb[11].mxu1 }
 0x2a4   :  { %v2523_v27 = vadd.f32 %v2522_v29, %v2521_v51 }
 0x2ab   :  { %v2486_v4 = vpop.f32.mrb[10].mxu0 }
 0x2ac   :  { %v2487_v15 = vpop.f32.mrb[11].mxu0 }
 0x2ad   :  { %v2488_v50 = vadd.f32 %v2487_v15, %v2486_v4 }
 0x2af   :  { %v1966_v0 = vadd.f32 %v2488_v50, %v1798_v30 }
 0x2b1   :  { %v2070_v58 = vadd.f32 %v2523_v27, %v1966_v0 }
 0x2b3   :  { %2073 = vst [vmem:[#allocation7] sm:$0xf] %v2070_v58 }
 0x2b4   :  { %2995 = shalt.err (!%p2992_p0)
}
 0x2b5   :  { %s2996_s10 = scalar_lea.hbm %s4507_s3, 64 }
 0x2b6   :  { %p2997_p1 = scmp.ne.s32.totalorder %s4507_s3, %s2996_s10  ;;  %p3000_p2 = scmp.lt.u32.totalorder %s2996_s10, %s4507_s3 }
 0x2b8   :  { %p3002_p3 = pnand %p3000_p2, %p2997_p1 }
 0x2ba   :  { %3005 = shalt.err (!%p3002_p3)
}
 0x2bb   :  { %2083 = dma.vmem_to_hbm [thread:$0]  %s2081_s6, 64, %s4507_s3, [#allocation4]  }
 0x2bc   :  { %3010 = dma.done.wait [#allocation4], 64  }
 0x2bd   :  { %3011 = vsyncadd [#allocation4], 4294967232 }
 0x2be   :  { %3012 = dma.done.wait [#allocation9], 256  }
 0x2bf   :  { %3013 = vsyncadd [#allocation9], 4294967040 }
 0x2c0   :  { %2100 = vsyncpa [#allocation3], 1 }
 0x2c1   :  { %2101 = vsyncpa [#allocation6], 1 }
 0x2c2   :  { %2102 = vsyncpa [#allocation4], 1 }
 0x2c3   :  { %2103 = vsyncpa [#allocation9], 1 }

</bundles_post_ra>
